<compile_context>
chip_gen: v7x
topology: tpu7x:2x2x1
jax: 0.10.0
libtpu: 0.0.40
codegen_flags: <defaults>
</compile_context>

<pallas_src>
import functools

import jax
import jax.numpy as jnp
from jax.experimental import pallas as pl
from jax.experimental.pallas import tpu as pltpu


# ---------------------------------------------------------------------------
# Fused kernel: emits [loss, global_loss, reg_global*lr, kp_loss*lk, ld_loss*ll]
# ---------------------------------------------------------------------------
def _fused_loss_kernel(h_ref, gq_ref, gk_ref, kq_ref, adj_ref,
                       sq_ref, gtq_ref, sk_ref, gtk_ref,
                       kp_ref, kpwT_ref, ldT_ref, ldw_ref, out_ref,
                       *, temp, self_learning, lam_reg, lam_kp, lam_ld,
                       positive_margin, negative_margin):
    inv_temp = 1.0 / temp            # compile-time constant -> plain VPU multiply

    # ---- global descriptor losses (reg_global + global_loss) --------------
    def bce_logits_mean(x, y):
        return jnp.mean(jnp.maximum(x, 0.0) - x * y + jnp.log1p(jnp.exp(-jnp.abs(x))))

    gq = gq_ref[...]                                                 # [B, D]
    b = gq.shape[0]
    norm_q = jnp.sqrt(jnp.sum(gq * gq, axis=1, keepdims=True))       # [B, 1]
    reg = jnp.sum((norm_q - 1.0) ** 2) * (1.0 / b)

    omega = jnp.dot(gq, kq_ref[...], preferred_element_type=jnp.float32) * inv_temp
    gl = bce_logits_mean(omega, adj_ref[...])

    if self_learning:
        gk = gk_ref[...]                                             # [B, D]
        norm_k = jnp.sqrt(jnp.sum(gk * gk, axis=1, keepdims=True))
        reg = reg + jnp.sum((norm_k - 1.0) ** 2) * (1.0 / b)
        self_omega = jnp.sum(gq * gk, axis=1, keepdims=True) * inv_temp
        gl = gl + bce_logits_mean(self_omega, jnp.ones_like(self_omega))

    # ---- keypoint score-map BCE (lane-dense [B, Hs*Ws]) --------------------
    def bce_mean(p, y):
        return -jnp.mean(y * jnp.log(p) + (1.0 - y) * jnp.log(1.0 - p))

    kp_loss = bce_mean(sq_ref[...], gtq_ref[...]) + bce_mean(sk_ref[...], gtk_ref[...])

    # ---- local-descriptor contrastive loss ---------------------------------
    nimg = kp_ref.shape[0]
    n = kp_ref.shape[1]              # keypoints per key image
    m = kpwT_ref.shape[2]            # keypoints per query image

    # One MXU pass for all images; diagonal blocks are the per-image Grams.
    ld_full = jnp.dot(ldT_ref[...], ldw_ref[...],
                      preferred_element_type=jnp.float32)            # [nimg*N, nimg*M]

    total = jnp.float32(0.0)
    for i in range(nimg):            # nimg is small & static
        kp = kp_ref[i]               # [N, 2]  (row, col)
        kpwT = kpwT_ref[i]           # [2, M]  (row 0: row-coords, row 1: col-coords)
        u = kp[:, 1:2]               # col -> x
        v = kp[:, 0:1]               # row -> y
        h00, h01, h02 = h_ref[9 * i + 0], h_ref[9 * i + 1], h_ref[9 * i + 2]
        h10, h11, h12 = h_ref[9 * i + 3], h_ref[9 * i + 4], h_ref[9 * i + 5]
        h20, h21, h22 = h_ref[9 * i + 6], h_ref[9 * i + 7], h_ref[9 * i + 8]
        p0 = h00 * u + h01 * v + h02
        p1 = h10 * u + h11 * v + h12
        p2 = h20 * u + h21 * v + h22
        inv_p2 = pl.reciprocal(p2, approx=False)
        q0 = p0 * inv_p2             # warped x
        q1 = p1 * inv_p2             # warped y
        d0 = q1 - kpwT[0:1, :]       # [N, M] row deltas
        d1 = q0 - kpwT[1:2, :]       # [N, M] col deltas
        dist2 = d0 * d0 + d1 * d1
        pos = dist2 <= 64.0          # boolean mask; no sqrt (threshold squared)

        ld_mat = ld_full[i * n:(i + 1) * n, i * m:(i + 1) * m]       # [N, M]

        loss_p = jnp.where(pos, jnp.maximum(0.0, positive_margin - ld_mat), 0.0)
        loss_m = jnp.where(pos, 0.0, jnp.maximum(0.0, ld_mat - negative_margin))
        n_pos = jnp.sum(pos.astype(jnp.float32))
        n_neg = jnp.float32(n * m) - n_pos
        # NOTE: matches reference semantics; NaN/Inf if an image has no pos/neg pairs.
        total = total + jnp.sum(loss_p) / n_pos + jnp.sum(loss_m) / n_neg

    ld_loss = total * (1.0 / nimg)

    # ---- weighted scalars, all written on-chip -----------------------------
    reg_w = reg * lam_reg
    kp_w = kp_loss * lam_kp
    ld_w = ld_loss * lam_ld
    out_ref[0] = gl + reg_w + kp_w + ld_w
    out_ref[1] = gl
    out_ref[2] = reg_w
    out_ref[3] = kp_w
    out_ref[4] = ld_w


# ---------------------------------------------------------------------------
# Wrapper
# ---------------------------------------------------------------------------
_VMEM = pl.BlockSpec(memory_space=pltpu.MemorySpace.VMEM)
_SMEM = pl.BlockSpec(memory_space=pltpu.MemorySpace.SMEM)


def loss_dcsnn_forward(key_queue, adj_mat, kpts_gt_k, kpts_gt_q, net_out, H,
                       lamda=(0.1, 10.0, 0.001), temp=0.5, self_learning=True):
    lam_reg, lam_kp, lam_ld = lamda
    f32 = jnp.float32

    gq = net_out['globaldesc_q'].astype(f32)
    gk = net_out['globaldesc_k'].astype(f32)
    kq = key_queue.astype(f32)
    adj = adj_mat.astype(f32)

    # Lane-dense score maps: [B, Hs, Ws] -> [B, Hs*Ws]  (layout plumbing only).
    def flat_map(x):
        x = jnp.squeeze(x)
        return x.reshape(x.shape[0], -1).astype(f32)

    sq = flat_map(net_out['scores_map_q'])
    gtq = flat_map(kpts_gt_q)
    sk = flat_map(net_out['scores_map_k'])
    gtk = flat_map(kpts_gt_k)

    # TODO(synk): assumes all images have the same (N, M) keypoint counts so the
    # per-image lists can be stacked; ragged lists would need per-image handling.
    ldT_cat = jnp.concatenate(net_out['localdesc_k'], axis=1).T.astype(f32)   # [nimg*N, Dl]
    ldw_cat = jnp.concatenate(net_out['localdesc_q'], axis=1).astype(f32)     # [Dl, nimg*M]
    kpts_k = jnp.stack(net_out['kpts_k']).astype(f32)                         # [nimg, N, 2]
    kpts_qT = jnp.transpose(jnp.stack(net_out['kpts_q']), (0, 2, 1)).astype(f32)  # [nimg, 2, M]
    h_flat = H.reshape(-1).astype(f32)                                        # [nimg*9] (1-D SMEM)

    # TODO(synk): at production sizes tile key_queue over Q (grid axis marked
    # 'arbitrary' + accumulator) and row-tile the score maps; on v6e/v7x the
    # omega matmul operands could be cast to bf16.  The toy sizes here fit a
    # single fused VMEM block, so one gridless call minimizes launch overhead.
    out = pl.pallas_call(
        functools.partial(
            _fused_loss_kernel, temp=temp, self_learning=self_learning,
            lam_reg=lam_reg, lam_kp=lam_kp, lam_ld=lam_ld,
            positive_margin=1.0, negative_margin=0.2),
        out_shape=jax.ShapeDtypeStruct((5,), jnp.float32),
        in_specs=[_SMEM] + [_VMEM] * 12,
        out_specs=_SMEM,
    )(h_flat, gq, gk, kq, adj, sq, gtq, sk, gtk, kpts_k, kpts_qT, ldT_cat, ldw_cat)

    return out[0], out[1], out[2], out[3], out[4]


# ---------------------------------------------------------------------------
# Pure-JAX reference (mirrors the PyTorch semantics) for a sanity check
# ---------------------------------------------------------------------------
def _ref_forward(key_queue, adj_mat, kpts_gt_k, kpts_gt_q, net_out, H,
                 lamda=(0.1, 10.0, 0.001), temp=0.5, self_learning=True):
    lam_reg, lam_kp, lam_ld = lamda
    gq, gk = net_out['globaldesc_q'], net_out['globaldesc_k']

    norm = jnp.linalg.norm(gq, axis=1)
    reg_global = jnp.mean((norm - 1.0) ** 2)
    omega = gq @ key_queue / temp

    def bce_logits(x, y):
        return jnp.mean(jnp.maximum(x, 0.0) - x * y + jnp.log1p(jnp.exp(-jnp.abs(x))))

    global_loss = bce_logits(omega, adj_mat)
    if self_learning:
        norm_k = jnp.linalg.norm(gk, axis=1)
        reg_global = reg_global + jnp.mean((norm_k - 1.0) ** 2)
        so = jnp.sum(gq * gk, axis=1) / temp
        global_loss = global_loss + bce_logits(so, jnp.ones_like(so))

    def bce(p, y):
        return -jnp.mean(y * jnp.log(p) + (1.0 - y) * jnp.log(1.0 - p))

    kp_loss = (bce(net_out['scores_map_q'], jnp.squeeze(kpts_gt_q)) +
               bce(net_out['scores_map_k'], jnp.squeeze(kpts_gt_k)))

    nimg = len(net_out['kpts_k'])
    ld_loss = 0.0
    for ld, ldw, kp, kpw, h in zip(net_out['localdesc_k'], net_out['localdesc_q'],
                                   net_out['kpts_k'], net_out['kpts_q'], H):
        kpf = kp[:, ::-1]
        kph = jnp.concatenate([kpf, jnp.ones((kpf.shape[0], 1), jnp.float32)], axis=1)
        w = (h @ kph.T).T
        w = w / w[:, 2:3]
        w = w[:, :2][:, ::-1]
        dist = jnp.linalg.norm(w[:, None, :] - kpw[None, :, :], axis=-1)
        s = (dist <= 8.0).astype(jnp.float32)
        ld_mat = jnp.einsum('dl,dw->lw', ld, ldw)
        lp = jnp.maximum(0.0, 1.0 - ld_mat * s) * s
        lp = jnp.sum(lp) / jnp.sum(s)
        lm = jnp.maximum(0.0, ld_mat * (1.0 - s) - 0.2)
        lm = jnp.sum(lm) / jnp.sum(1.0 - s)
        ld_loss = ld_loss + lp + lm
    ld_loss = ld_loss / nimg

    reg_global = reg_global * lam_reg
    kp_loss = kp_loss * lam_kp
    ld_loss = ld_loss * lam_ld
    return (global_loss + reg_global + kp_loss + ld_loss,
            global_loss, reg_global, kp_loss, ld_loss)


# ---------------------------------------------------------------------------
if __name__ == "__main__":
    key = jax.random.PRNGKey(0)
    B, D, Q = 4, 32, 64          # batch, global-descriptor dim, queue size
    Hs, Ws = 16, 16              # score map size
    Dl, N, M = 32, 16, 16        # local-desc dim, kpts per k-image, per q-image
    nimg = B

    ks = jax.random.split(key, 16)

    globaldesc_q = jax.random.normal(ks[0], (B, D), jnp.float32) / jnp.sqrt(D)
    globaldesc_k = jax.random.normal(ks[1], (B, D), jnp.float32) / jnp.sqrt(D)
    key_queue = jax.random.normal(ks[2], (D, Q), jnp.float32) / jnp.sqrt(D)
    adj_mat = (jax.random.uniform(ks[3], (B, Q)) > 0.5).astype(jnp.float32)

    scores_q = jax.nn.sigmoid(jax.random.normal(ks[4], (B, Hs, Ws), jnp.float32))
    scores_k = jax.nn.sigmoid(jax.random.normal(ks[5], (B, Hs, Ws), jnp.float32))
    kpts_gt_q = jax.nn.sigmoid(jax.random.normal(ks[6], (B, 1, Hs, Ws), jnp.float32))
    kpts_gt_k = jax.nn.sigmoid(jax.random.normal(ks[7], (B, 1, Hs, Ws), jnp.float32))

    # Homographies: near identity (deterministic small perturbation).
    pert = 0.01 * jax.random.normal(ks[8], (nimg, 3, 3), jnp.float32)
    pert = pert.at[:, 2, 2].set(0.0)
    H = jnp.eye(3, dtype=jnp.float32)[None] + pert

    # Keypoints (row, col) in a 100x100 image; q-keypoints = warped k-keypoints
    # plus small noise so the positive set is non-empty.
    kpts_k_list, kpts_q_list, ld_k_list, ld_q_list = [], [], [], []
    kp_keys = jax.random.split(ks[9], nimg)
    noise_keys = jax.random.split(ks[10], nimg)
    ldk_keys = jax.random.split(ks[11], nimg)
    ldq_keys = jax.random.split(ks[12], nimg)
    for i in range(nimg):
        kp = jax.random.uniform(kp_keys[i], (N, 2), jnp.float32) * 100.0
        kpf = kp[:, ::-1]
        kph = jnp.concatenate([kpf, jnp.ones((N, 1), jnp.float32)], axis=1)
        w = (H[i] @ kph.T).T
        w = w / w[:, 2:3]
        kpw = w[:, :2][:, ::-1] + (jax.random.uniform(noise_keys[i], (M, 2)) - 0.5)
        kpts_k_list.append(kp)
        kpts_q_list.append(kpw)
        ldk = jax.random.normal(ldk_keys[i], (Dl, N), jnp.float32)
        ldq = jax.random.normal(ldq_keys[i], (Dl, M), jnp.float32)
        ld_k_list.append(ldk / jnp.linalg.norm(ldk, axis=0, keepdims=True))
        ld_q_list.append(ldq / jnp.linalg.norm(ldq, axis=0, keepdims=True))

    net_out = {
        'globaldesc_q': globaldesc_q,
        'globaldesc_k': globaldesc_k,
        'scores_map_q': scores_q,
        'scores_map_k': scores_k,
        'localdesc_k': ld_k_list,
        'localdesc_q': ld_q_list,
        'kpts_k': kpts_k_list,
        'kpts_q': kpts_q_list,
    }

    out = loss_dcsnn_forward(key_queue, adj_mat, kpts_gt_k, kpts_gt_q, net_out, H)
    out = jax.block_until_ready(out)

    ref = _ref_forward(key_queue, adj_mat, kpts_gt_k, kpts_gt_q, net_out, H)
    for got, exp in zip(out, ref):
        assert jnp.allclose(got, exp, rtol=1e-3, atol=1e-4), (got, exp)

    print("KERNEL_OK")
</pallas_src>

<mosaic_0001>
module attributes {stable_mosaic.version = 11 : i64} {
  func.func @_fused_loss_kernel(%arg0: memref<36xf32, #tpu.memory_space<smem>>, %arg1: memref<4x32xf32, #tpu.memory_space<vmem>>, %arg2: memref<4x32xf32, #tpu.memory_space<vmem>>, %arg3: memref<32x64xf32, #tpu.memory_space<vmem>>, %arg4: memref<4x64xf32, #tpu.memory_space<vmem>>, %arg5: memref<4x256xf32, #tpu.memory_space<vmem>>, %arg6: memref<4x256xf32, #tpu.memory_space<vmem>>, %arg7: memref<4x256xf32, #tpu.memory_space<vmem>>, %arg8: memref<4x256xf32, #tpu.memory_space<vmem>>, %arg9: memref<4x16x2xf32, #tpu.memory_space<vmem>>, %arg10: memref<4x2x16xf32, #tpu.memory_space<vmem>>, %arg11: memref<64x32xf32, #tpu.memory_space<vmem>>, %arg12: memref<32x64xf32, #tpu.memory_space<vmem>>, %arg13: memref<5xf32, #tpu.memory_space<smem>>) attributes {dimension_semantics = [], scalar_prefetch = 0 : i64, scratch_operands = 0 : i64, tpu.core_type = #tpu.core_type<tc>} {
    %c0 = arith.constant 0 : index
    %c0_0 = arith.constant 0 : index
    %0 = vector.load %arg1[%c0, %c0_0] : memref<4x32xf32, #tpu.memory_space<vmem>>, vector<4x32xf32>
    %1 = arith.mulf %0, %0 : vector<4x32xf32>
    %cst = arith.constant dense<0.000000e+00> : vector<4xf32>
    %2 = vector.multi_reduction <add>, %1, %cst [1] : vector<4x32xf32> to vector<4xf32>
    %3 = vector.shape_cast %2 : vector<4xf32> to vector<4x1xf32>
    %4 = math.sqrt %3 : vector<4x1xf32>
    %cst_1 = arith.constant 1.000000e+00 : f32
    %5 = vector.broadcast %cst_1 : f32 to vector<4x1xf32>
    %6 = arith.subf %4, %5 : vector<4x1xf32>
    %7 = arith.mulf %6, %6 : vector<4x1xf32>
    %8 = vector.shape_cast %7 : vector<4x1xf32> to vector<1x4x1xf32>
    %cst_2 = arith.constant dense<0.000000e+00> : vector<1xf32>
    %9 = vector.multi_reduction <add>, %8, %cst_2 [1, 2] : vector<1x4x1xf32> to vector<1xf32>
    %10 = vector.shape_cast %9 : vector<1xf32> to vector<1x1x1xf32>
    %11 = vector.extract %10[0, 0, 0] : f32 from vector<1x1x1xf32>
    %cst_3 = arith.constant 2.500000e-01 : f32
    %12 = arith.mulf %11, %cst_3 : f32
    %c0_4 = arith.constant 0 : index
    %c0_5 = arith.constant 0 : index
    %13 = vector.load %arg3[%c0_4, %c0_5] : memref<32x64xf32, #tpu.memory_space<vmem>>, vector<32x64xf32>
    %cst_6 = arith.constant dense<0.000000e+00> : vector<4x64xf32>
    %14 = tpu.matmul %0, %13, %cst_6 {dimension_numbers = #tpu.dot_dimension_numbers<[1], [0], [0], [1], [0, 0, 1, 1], [], []>} : vector<4x32xf32>, vector<32x64xf32>, vector<4x64xf32> -> vector<4x64xf32>
    %cst_7 = arith.constant 2.000000e+00 : f32
    %15 = vector.broadcast %cst_7 : f32 to vector<4x64xf32>
    %16 = arith.mulf %14, %15 : vector<4x64xf32>
    %c0_8 = arith.constant 0 : index
    %c0_9 = arith.constant 0 : index
    %17 = vector.load %arg4[%c0_8, %c0_9] : memref<4x64xf32, #tpu.memory_space<vmem>>, vector<4x64xf32>
    %cst_10 = arith.constant 0.000000e+00 : f32
    %18 = vector.broadcast %cst_10 : f32 to vector<4x64xf32>
    %19 = arith.maximumf %16, %18 : vector<4x64xf32>
    %20 = arith.mulf %16, %17 : vector<4x64xf32>
    %21 = arith.subf %19, %20 : vector<4x64xf32>
    %22 = math.absf %16 : vector<4x64xf32>
    %cst_11 = arith.constant 0.000000e+00 : f32
    %23 = vector.broadcast %cst_11 : f32 to vector<4x64xf32>
    %24 = arith.subf %23, %22 : vector<4x64xf32>
    %25 = math.exp %24 : vector<4x64xf32>
    %26 = math.log1p %25 : vector<4x64xf32>
    %27 = arith.addf %21, %26 : vector<4x64xf32>
    %28 = vector.shape_cast %27 : vector<4x64xf32> to vector<1x4x64xf32>
    %cst_12 = arith.constant dense<0.000000e+00> : vector<1xf32>
    %29 = vector.multi_reduction <add>, %28, %cst_12 [1, 2] : vector<1x4x64xf32> to vector<1xf32>
    %30 = vector.shape_cast %29 : vector<1xf32> to vector<1x1x1xf32>
    %31 = vector.extract %30[0, 0, 0] : f32 from vector<1x1x1xf32>
    %cst_13 = arith.constant 2.560000e+02 : f32
    %32 = arith.divf %31, %cst_13 : f32
    %c0_14 = arith.constant 0 : index
    %c0_15 = arith.constant 0 : index
    %33 = vector.load %arg2[%c0_14, %c0_15] : memref<4x32xf32, #tpu.memory_space<vmem>>, vector<4x32xf32>
    %34 = arith.mulf %33, %33 : vector<4x32xf32>
    %cst_16 = arith.constant dense<0.000000e+00> : vector<4xf32>
    %35 = vector.multi_reduction <add>, %34, %cst_16 [1] : vector<4x32xf32> to vector<4xf32>
    %36 = vector.shape_cast %35 : vector<4xf32> to vector<4x1xf32>
    %37 = math.sqrt %36 : vector<4x1xf32>
    %cst_17 = arith.constant 1.000000e+00 : f32
    %38 = vector.broadcast %cst_17 : f32 to vector<4x1xf32>
    %39 = arith.subf %37, %38 : vector<4x1xf32>
    %40 = arith.mulf %39, %39 : vector<4x1xf32>
    %41 = vector.shape_cast %40 : vector<4x1xf32> to vector<1x4x1xf32>
    %cst_18 = arith.constant dense<0.000000e+00> : vector<1xf32>
    %42 = vector.multi_reduction <add>, %41, %cst_18 [1, 2] : vector<1x4x1xf32> to vector<1xf32>
    %43 = vector.shape_cast %42 : vector<1xf32> to vector<1x1x1xf32>
    %44 = vector.extract %43[0, 0, 0] : f32 from vector<1x1x1xf32>
    %cst_19 = arith.constant 2.500000e-01 : f32
    %45 = arith.mulf %44, %cst_19 : f32
    %46 = arith.addf %12, %45 : f32
    %47 = arith.mulf %0, %33 : vector<4x32xf32>
    %cst_20 = arith.constant dense<0.000000e+00> : vector<4xf32>
    %48 = vector.multi_reduction <add>, %47, %cst_20 [1] : vector<4x32xf32> to vector<4xf32>
    %49 = vector.shape_cast %48 : vector<4xf32> to vector<4x1xf32>
    %cst_21 = arith.constant 2.000000e+00 : f32
    %50 = vector.broadcast %cst_21 : f32 to vector<4x1xf32>
    %51 = arith.mulf %49, %50 : vector<4x1xf32>
    %cst_22 = arith.constant 1.000000e+00 : f32
    %52 = vector.broadcast %cst_22 : f32 to vector<4x1xf32>
    %cst_23 = arith.constant 0.000000e+00 : f32
    %53 = vector.broadcast %cst_23 : f32 to vector<4x1xf32>
    %54 = arith.maximumf %51, %53 : vector<4x1xf32>
    %55 = arith.mulf %51, %52 : vector<4x1xf32>
    %56 = arith.subf %54, %55 : vector<4x1xf32>
    %57 = math.absf %51 : vector<4x1xf32>
    %cst_24 = arith.constant 0.000000e+00 : f32
    %58 = vector.broadcast %cst_24 : f32 to vector<4x1xf32>
    %59 = arith.subf %58, %57 : vector<4x1xf32>
    %60 = math.exp %59 : vector<4x1xf32>
    %61 = math.log1p %60 : vector<4x1xf32>
    %62 = arith.addf %56, %61 : vector<4x1xf32>
    %63 = vector.shape_cast %62 : vector<4x1xf32> to vector<1x4x1xf32>
    %cst_25 = arith.constant dense<0.000000e+00> : vector<1xf32>
    %64 = vector.multi_reduction <add>, %63, %cst_25 [1, 2] : vector<1x4x1xf32> to vector<1xf32>
    %65 = vector.shape_cast %64 : vector<1xf32> to vector<1x1x1xf32>
    %66 = vector.extract %65[0, 0, 0] : f32 from vector<1x1x1xf32>
    %cst_26 = arith.constant 4.000000e+00 : f32
    %67 = arith.divf %66, %cst_26 : f32
    %68 = arith.addf %32, %67 : f32
    %c0_27 = arith.constant 0 : index
    %c0_28 = arith.constant 0 : index
    %69 = vector.load %arg5[%c0_27, %c0_28] : memref<4x256xf32, #tpu.memory_space<vmem>>, vector<4x256xf32>
    %c0_29 = arith.constant 0 : index
    %c0_30 = arith.constant 0 : index
    %70 = vector.load %arg6[%c0_29, %c0_30] : memref<4x256xf32, #tpu.memory_space<vmem>>, vector<4x256xf32>
    %71 = math.log %69 : vector<4x256xf32>
    %72 = arith.mulf %70, %71 : vector<4x256xf32>
    %cst_31 = arith.constant 1.000000e+00 : f32
    %73 = vector.broadcast %cst_31 : f32 to vector<4x256xf32>
    %74 = arith.subf %73, %70 : vector<4x256xf32>
    %cst_32 = arith.constant 1.000000e+00 : f32
    %75 = vector.broadcast %cst_32 : f32 to vector<4x256xf32>
    %76 = arith.subf %75, %69 : vector<4x256xf32>
    %77 = math.log %76 : vector<4x256xf32>
    %78 = arith.mulf %74, %77 : vector<4x256xf32>
    %79 = arith.addf %72, %78 : vector<4x256xf32>
    %80 = vector.shape_cast %79 : vector<4x256xf32> to vector<1x4x256xf32>
    %cst_33 = arith.constant dense<0.000000e+00> : vector<1xf32>
    %81 = vector.multi_reduction <add>, %80, %cst_33 [1, 2] : vector<1x4x256xf32> to vector<1xf32>
    %82 = vector.shape_cast %81 : vector<1xf32> to vector<1x1x1xf32>
    %83 = vector.extract %82[0, 0, 0] : f32 from vector<1x1x1xf32>
    %cst_34 = arith.constant 1.024000e+03 : f32
    %84 = arith.divf %83, %cst_34 : f32
    %cst_35 = arith.constant 0.000000e+00 : f32
    %85 = arith.subf %cst_35, %84 : f32
    %c0_36 = arith.constant 0 : index
    %c0_37 = arith.constant 0 : index
    %86 = vector.load %arg7[%c0_36, %c0_37] : memref<4x256xf32, #tpu.memory_space<vmem>>, vector<4x256xf32>
    %c0_38 = arith.constant 0 : index
    %c0_39 = arith.constant 0 : index
    %87 = vector.load %arg8[%c0_38, %c0_39] : memref<4x256xf32, #tpu.memory_space<vmem>>, vector<4x256xf32>
    %88 = math.log %86 : vector<4x256xf32>
    %89 = arith.mulf %87, %88 : vector<4x256xf32>
    %cst_40 = arith.constant 1.000000e+00 : f32
    %90 = vector.broadcast %cst_40 : f32 to vector<4x256xf32>
    %91 = arith.subf %90, %87 : vector<4x256xf32>
    %cst_41 = arith.constant 1.000000e+00 : f32
    %92 = vector.broadcast %cst_41 : f32 to vector<4x256xf32>
    %93 = arith.subf %92, %86 : vector<4x256xf32>
    %94 = math.log %93 : vector<4x256xf32>
    %95 = arith.mulf %91, %94 : vector<4x256xf32>
    %96 = arith.addf %89, %95 : vector<4x256xf32>
    %97 = vector.shape_cast %96 : vector<4x256xf32> to vector<1x4x256xf32>
    %cst_42 = arith.constant dense<0.000000e+00> : vector<1xf32>
    %98 = vector.multi_reduction <add>, %97, %cst_42 [1, 2] : vector<1x4x256xf32> to vector<1xf32>
    %99 = vector.shape_cast %98 : vector<1xf32> to vector<1x1x1xf32>
    %100 = vector.extract %99[0, 0, 0] : f32 from vector<1x1x1xf32>
    %cst_43 = arith.constant 1.024000e+03 : f32
    %101 = arith.divf %100, %cst_43 : f32
    %cst_44 = arith.constant 0.000000e+00 : f32
    %102 = arith.subf %cst_44, %101 : f32
    %103 = arith.addf %85, %102 : f32
    %c0_45 = arith.constant 0 : index
    %c0_46 = arith.constant 0 : index
    %104 = vector.load %arg11[%c0_45, %c0_46] : memref<64x32xf32, #tpu.memory_space<vmem>>, vector<64x32xf32>
    %c0_47 = arith.constant 0 : index
    %c0_48 = arith.constant 0 : index
    %105 = vector.load %arg12[%c0_47, %c0_48] : memref<32x64xf32, #tpu.memory_space<vmem>>, vector<32x64xf32>
    %cst_49 = arith.constant dense<0.000000e+00> : vector<64x64xf32>
    %106 = tpu.matmul %104, %105, %cst_49 {dimension_numbers = #tpu.dot_dimension_numbers<[1], [0], [0], [1], [0, 0, 1, 1], [], []>} : vector<64x32xf32>, vector<32x64xf32>, vector<64x64xf32> -> vector<64x64xf32>
    %c0_50 = arith.constant 0 : index
    %c0_51 = arith.constant 0 : index
    %c0_52 = arith.constant 0 : index
    %107 = vector.load %arg9[%c0_50, %c0_51, %c0_52] : memref<4x16x2xf32, #tpu.memory_space<vmem>>, vector<1x16x2xf32>
    %108 = vector.shape_cast %107 : vector<1x16x2xf32> to vector<16x2xf32>
    %c0_53 = arith.constant 0 : index
    %c0_54 = arith.constant 0 : index
    %c0_55 = arith.constant 0 : index
    %109 = vector.load %arg10[%c0_53, %c0_54, %c0_55] : memref<4x2x16xf32, #tpu.memory_space<vmem>>, vector<1x2x16xf32>
    %110 = vector.shape_cast %109 : vector<1x2x16xf32> to vector<2x16xf32>
    %111 = vector.extract_strided_slice %108 {offsets = [0, 1], sizes = [16, 1], strides = [1, 1]} : vector<16x2xf32> to vector<16x1xf32>
    %112 = vector.extract_strided_slice %108 {offsets = [0, 0], sizes = [16, 1], strides = [1, 1]} : vector<16x2xf32> to vector<16x1xf32>
    %c0_56 = arith.constant 0 : index
    %113 = memref.load %arg0[%c0_56] : memref<36xf32, #tpu.memory_space<smem>>
    %c1 = arith.constant 1 : index
    %114 = memref.load %arg0[%c1] : memref<36xf32, #tpu.memory_space<smem>>
    %c2 = arith.constant 2 : index
    %115 = memref.load %arg0[%c2] : memref<36xf32, #tpu.memory_space<smem>>
    %c3 = arith.constant 3 : index
    %116 = memref.load %arg0[%c3] : memref<36xf32, #tpu.memory_space<smem>>
    %c4 = arith.constant 4 : index
    %117 = memref.load %arg0[%c4] : memref<36xf32, #tpu.memory_space<smem>>
    %c5 = arith.constant 5 : index
    %118 = memref.load %arg0[%c5] : memref<36xf32, #tpu.memory_space<smem>>
    %c6 = arith.constant 6 : index
    %119 = memref.load %arg0[%c6] : memref<36xf32, #tpu.memory_space<smem>>
    %c7 = arith.constant 7 : index
    %120 = memref.load %arg0[%c7] : memref<36xf32, #tpu.memory_space<smem>>
    %c8 = arith.constant 8 : index
    %121 = memref.load %arg0[%c8] : memref<36xf32, #tpu.memory_space<smem>>
    %122 = vector.broadcast %113 : f32 to vector<16x1xf32>
    %123 = arith.mulf %122, %111 : vector<16x1xf32>
    %124 = vector.broadcast %114 : f32 to vector<16x1xf32>
    %125 = arith.mulf %124, %112 : vector<16x1xf32>
    %126 = arith.addf %123, %125 : vector<16x1xf32>
    %127 = vector.broadcast %115 : f32 to vector<16x1xf32>
    %128 = arith.addf %126, %127 : vector<16x1xf32>
    %129 = vector.broadcast %116 : f32 to vector<16x1xf32>
    %130 = arith.mulf %129, %111 : vector<16x1xf32>
    %131 = vector.broadcast %117 : f32 to vector<16x1xf32>
    %132 = arith.mulf %131, %112 : vector<16x1xf32>
    %133 = arith.addf %130, %132 : vector<16x1xf32>
    %134 = vector.broadcast %118 : f32 to vector<16x1xf32>
    %135 = arith.addf %133, %134 : vector<16x1xf32>
    %136 = vector.broadcast %119 : f32 to vector<16x1xf32>
    %137 = arith.mulf %136, %111 : vector<16x1xf32>
    %138 = vector.broadcast %120 : f32 to vector<16x1xf32>
    %139 = arith.mulf %138, %112 : vector<16x1xf32>
    %140 = arith.addf %137, %139 : vector<16x1xf32>
    %141 = vector.broadcast %121 : f32 to vector<16x1xf32>
    %142 = arith.addf %140, %141 : vector<16x1xf32>
    %143 = tpu.reciprocal %142 : vector<16x1xf32> -> vector<16x1xf32>
    %144 = arith.mulf %128, %143 : vector<16x1xf32>
    %145 = arith.mulf %135, %143 : vector<16x1xf32>
    %146 = vector.extract_strided_slice %110 {offsets = [0, 0], sizes = [1, 16], strides = [1, 1]} : vector<2x16xf32> to vector<1x16xf32>
    %147 = vector.broadcast %145 : vector<16x1xf32> to vector<16x16xf32>
    %148 = vector.broadcast %146 : vector<1x16xf32> to vector<16x16xf32>
    %149 = arith.subf %147, %148 : vector<16x16xf32>
    %150 = vector.extract_strided_slice %110 {offsets = [1, 0], sizes = [1, 16], strides = [1, 1]} : vector<2x16xf32> to vector<1x16xf32>
    %151 = vector.broadcast %144 : vector<16x1xf32> to vector<16x16xf32>
    %152 = vector.broadcast %150 : vector<1x16xf32> to vector<16x16xf32>
    %153 = arith.subf %151, %152 : vector<16x16xf32>
    %154 = arith.mulf %149, %149 : vector<16x16xf32>
    %155 = arith.mulf %153, %153 : vector<16x16xf32>
    %156 = arith.addf %154, %155 : vector<16x16xf32>
    %cst_57 = arith.constant 6.400000e+01 : f32
    %157 = vector.broadcast %cst_57 : f32 to vector<16x16xf32>
    %158 = arith.cmpf ole, %156, %157 : vector<16x16xf32>
    %159 = vector.extract_strided_slice %106 {offsets = [0, 0], sizes = [16, 16], strides = [1, 1]} : vector<64x64xf32> to vector<16x16xf32>
    %cst_58 = arith.constant 1.000000e+00 : f32
    %160 = vector.broadcast %cst_58 : f32 to vector<16x16xf32>
    %161 = arith.subf %160, %159 : vector<16x16xf32>
    %cst_59 = arith.constant 0.000000e+00 : f32
    %162 = vector.broadcast %cst_59 : f32 to vector<16x16xf32>
    %163 = arith.maximumf %162, %161 : vector<16x16xf32>
    %cst_60 = arith.constant 0.000000e+00 : f32
    %164 = vector.broadcast %cst_60 : f32 to vector<16x16xf32>
    %165 = arith.select %158, %163, %164 : vector<16x16xi1>, vector<16x16xf32>
    %cst_61 = arith.constant 2.000000e-01 : f32
    %166 = vector.broadcast %cst_61 : f32 to vector<16x16xf32>
    %167 = arith.subf %159, %166 : vector<16x16xf32>
    %cst_62 = arith.constant 0.000000e+00 : f32
    %168 = vector.broadcast %cst_62 : f32 to vector<16x16xf32>
    %169 = arith.maximumf %168, %167 : vector<16x16xf32>
    %cst_63 = arith.constant 0.000000e+00 : f32
    %170 = vector.broadcast %cst_63 : f32 to vector<16x16xf32>
    %171 = arith.select %158, %170, %169 : vector<16x16xi1>, vector<16x16xf32>
    %172 = arith.extui %158 : vector<16x16xi1> to vector<16x16xi32>
    %173 = arith.sitofp %172 : vector<16x16xi32> to vector<16x16xf32>
    %174 = vector.shape_cast %173 : vector<16x16xf32> to vector<1x16x16xf32>
    %cst_64 = arith.constant dense<0.000000e+00> : vector<1xf32>
    %175 = vector.multi_reduction <add>, %174, %cst_64 [1, 2] : vector<1x16x16xf32> to vector<1xf32>
    %176 = vector.shape_cast %175 : vector<1xf32> to vector<1x1x1xf32>
    %177 = vector.extract %176[0, 0, 0] : f32 from vector<1x1x1xf32>
    %cst_65 = arith.constant 2.560000e+02 : f32
    %178 = arith.subf %cst_65, %177 : f32
    %179 = vector.shape_cast %165 : vector<16x16xf32> to vector<1x16x16xf32>
    %cst_66 = arith.constant dense<0.000000e+00> : vector<1xf32>
    %180 = vector.multi_reduction <add>, %179, %cst_66 [1, 2] : vector<1x16x16xf32> to vector<1xf32>
    %181 = vector.shape_cast %180 : vector<1xf32> to vector<1x1x1xf32>
    %182 = vector.extract %181[0, 0, 0] : f32 from vector<1x1x1xf32>
    %183 = arith.divf %182, %177 : f32
    %cst_67 = arith.constant 0.000000e+00 : f32
    %184 = arith.addf %cst_67, %183 : f32
    %185 = vector.shape_cast %171 : vector<16x16xf32> to vector<1x16x16xf32>
    %cst_68 = arith.constant dense<0.000000e+00> : vector<1xf32>
    %186 = vector.multi_reduction <add>, %185, %cst_68 [1, 2] : vector<1x16x16xf32> to vector<1xf32>
    %187 = vector.shape_cast %186 : vector<1xf32> to vector<1x1x1xf32>
    %188 = vector.extract %187[0, 0, 0] : f32 from vector<1x1x1xf32>
    %189 = arith.divf %188, %178 : f32
    %190 = arith.addf %184, %189 : f32
    %c1_69 = arith.constant 1 : index
    %c0_70 = arith.constant 0 : index
    %c0_71 = arith.constant 0 : index
    %191 = vector.load %arg9[%c1_69, %c0_70, %c0_71] : memref<4x16x2xf32, #tpu.memory_space<vmem>>, vector<1x16x2xf32>
    %192 = vector.shape_cast %191 : vector<1x16x2xf32> to vector<16x2xf32>
    %c1_72 = arith.constant 1 : index
    %c0_73 = arith.constant 0 : index
    %c0_74 = arith.constant 0 : index
    %193 = vector.load %arg10[%c1_72, %c0_73, %c0_74] : memref<4x2x16xf32, #tpu.memory_space<vmem>>, vector<1x2x16xf32>
    %194 = vector.shape_cast %193 : vector<1x2x16xf32> to vector<2x16xf32>
    %195 = vector.extract_strided_slice %192 {offsets = [0, 1], sizes = [16, 1], strides = [1, 1]} : vector<16x2xf32> to vector<16x1xf32>
    %196 = vector.extract_strided_slice %192 {offsets = [0, 0], sizes = [16, 1], strides = [1, 1]} : vector<16x2xf32> to vector<16x1xf32>
    %c9 = arith.constant 9 : index
    %197 = memref.load %arg0[%c9] : memref<36xf32, #tpu.memory_space<smem>>
    %c10 = arith.constant 10 : index
    %198 = memref.load %arg0[%c10] : memref<36xf32, #tpu.memory_space<smem>>
    %c11 = arith.constant 11 : index
    %199 = memref.load %arg0[%c11] : memref<36xf32, #tpu.memory_space<smem>>
    %c12 = arith.constant 12 : index
    %200 = memref.load %arg0[%c12] : memref<36xf32, #tpu.memory_space<smem>>
    %c13 = arith.constant 13 : index
    %201 = memref.load %arg0[%c13] : memref<36xf32, #tpu.memory_space<smem>>
    %c14 = arith.constant 14 : index
    %202 = memref.load %arg0[%c14] : memref<36xf32, #tpu.memory_space<smem>>
    %c15 = arith.constant 15 : index
    %203 = memref.load %arg0[%c15] : memref<36xf32, #tpu.memory_space<smem>>
    %c16 = arith.constant 16 : index
    %204 = memref.load %arg0[%c16] : memref<36xf32, #tpu.memory_space<smem>>
    %c17 = arith.constant 17 : index
    %205 = memref.load %arg0[%c17] : memref<36xf32, #tpu.memory_space<smem>>
    %206 = vector.broadcast %197 : f32 to vector<16x1xf32>
    %207 = arith.mulf %206, %195 : vector<16x1xf32>
    %208 = vector.broadcast %198 : f32 to vector<16x1xf32>
    %209 = arith.mulf %208, %196 : vector<16x1xf32>
    %210 = arith.addf %207, %209 : vector<16x1xf32>
    %211 = vector.broadcast %199 : f32 to vector<16x1xf32>
    %212 = arith.addf %210, %211 : vector<16x1xf32>
    %213 = vector.broadcast %200 : f32 to vector<16x1xf32>
    %214 = arith.mulf %213, %195 : vector<16x1xf32>
    %215 = vector.broadcast %201 : f32 to vector<16x1xf32>
    %216 = arith.mulf %215, %196 : vector<16x1xf32>
    %217 = arith.addf %214, %216 : vector<16x1xf32>
    %218 = vector.broadcast %202 : f32 to vector<16x1xf32>
    %219 = arith.addf %217, %218 : vector<16x1xf32>
    %220 = vector.broadcast %203 : f32 to vector<16x1xf32>
    %221 = arith.mulf %220, %195 : vector<16x1xf32>
    %222 = vector.broadcast %204 : f32 to vector<16x1xf32>
    %223 = arith.mulf %222, %196 : vector<16x1xf32>
    %224 = arith.addf %221, %223 : vector<16x1xf32>
    %225 = vector.broadcast %205 : f32 to vector<16x1xf32>
    %226 = arith.addf %224, %225 : vector<16x1xf32>
    %227 = tpu.reciprocal %226 : vector<16x1xf32> -> vector<16x1xf32>
    %228 = arith.mulf %212, %227 : vector<16x1xf32>
    %229 = arith.mulf %219, %227 : vector<16x1xf32>
    %230 = vector.extract_strided_slice %194 {offsets = [0, 0], sizes = [1, 16], strides = [1, 1]} : vector<2x16xf32> to vector<1x16xf32>
    %231 = vector.broadcast %229 : vector<16x1xf32> to vector<16x16xf32>
    %232 = vector.broadcast %230 : vector<1x16xf32> to vector<16x16xf32>
    %233 = arith.subf %231, %232 : vector<16x16xf32>
    %234 = vector.extract_strided_slice %194 {offsets = [1, 0], sizes = [1, 16], strides = [1, 1]} : vector<2x16xf32> to vector<1x16xf32>
    %235 = vector.broadcast %228 : vector<16x1xf32> to vector<16x16xf32>
    %236 = vector.broadcast %234 : vector<1x16xf32> to vector<16x16xf32>
    %237 = arith.subf %235, %236 : vector<16x16xf32>
    %238 = arith.mulf %233, %233 : vector<16x16xf32>
    %239 = arith.mulf %237, %237 : vector<16x16xf32>
    %240 = arith.addf %238, %239 : vector<16x16xf32>
    %cst_75 = arith.constant 6.400000e+01 : f32
    %241 = vector.broadcast %cst_75 : f32 to vector<16x16xf32>
    %242 = arith.cmpf ole, %240, %241 : vector<16x16xf32>
    %243 = vector.extract_strided_slice %106 {offsets = [16, 16], sizes = [16, 16], strides = [1, 1]} : vector<64x64xf32> to vector<16x16xf32>
    %cst_76 = arith.constant 1.000000e+00 : f32
    %244 = vector.broadcast %cst_76 : f32 to vector<16x16xf32>
    %245 = arith.subf %244, %243 : vector<16x16xf32>
    %cst_77 = arith.constant 0.000000e+00 : f32
    %246 = vector.broadcast %cst_77 : f32 to vector<16x16xf32>
    %247 = arith.maximumf %246, %245 : vector<16x16xf32>
    %cst_78 = arith.constant 0.000000e+00 : f32
    %248 = vector.broadcast %cst_78 : f32 to vector<16x16xf32>
    %249 = arith.select %242, %247, %248 : vector<16x16xi1>, vector<16x16xf32>
    %cst_79 = arith.constant 2.000000e-01 : f32
    %250 = vector.broadcast %cst_79 : f32 to vector<16x16xf32>
    %251 = arith.subf %243, %250 : vector<16x16xf32>
    %cst_80 = arith.constant 0.000000e+00 : f32
    %252 = vector.broadcast %cst_80 : f32 to vector<16x16xf32>
    %253 = arith.maximumf %252, %251 : vector<16x16xf32>
    %cst_81 = arith.constant 0.000000e+00 : f32
    %254 = vector.broadcast %cst_81 : f32 to vector<16x16xf32>
    %255 = arith.select %242, %254, %253 : vector<16x16xi1>, vector<16x16xf32>
    %256 = arith.extui %242 : vector<16x16xi1> to vector<16x16xi32>
    %257 = arith.sitofp %256 : vector<16x16xi32> to vector<16x16xf32>
    %258 = vector.shape_cast %257 : vector<16x16xf32> to vector<1x16x16xf32>
    %cst_82 = arith.constant dense<0.000000e+00> : vector<1xf32>
    %259 = vector.multi_reduction <add>, %258, %cst_82 [1, 2] : vector<1x16x16xf32> to vector<1xf32>
    %260 = vector.shape_cast %259 : vector<1xf32> to vector<1x1x1xf32>
    %261 = vector.extract %260[0, 0, 0] : f32 from vector<1x1x1xf32>
    %cst_83 = arith.constant 2.560000e+02 : f32
    %262 = arith.subf %cst_83, %261 : f32
    %263 = vector.shape_cast %249 : vector<16x16xf32> to vector<1x16x16xf32>
    %cst_84 = arith.constant dense<0.000000e+00> : vector<1xf32>
    %264 = vector.multi_reduction <add>, %263, %cst_84 [1, 2] : vector<1x16x16xf32> to vector<1xf32>
    %265 = vector.shape_cast %264 : vector<1xf32> to vector<1x1x1xf32>
    %266 = vector.extract %265[0, 0, 0] : f32 from vector<1x1x1xf32>
    %267 = arith.divf %266, %261 : f32
    %268 = arith.addf %190, %267 : f32
    %269 = vector.shape_cast %255 : vector<16x16xf32> to vector<1x16x16xf32>
    %cst_85 = arith.constant dense<0.000000e+00> : vector<1xf32>
    %270 = vector.multi_reduction <add>, %269, %cst_85 [1, 2] : vector<1x16x16xf32> to vector<1xf32>
    %271 = vector.shape_cast %270 : vector<1xf32> to vector<1x1x1xf32>
    %272 = vector.extract %271[0, 0, 0] : f32 from vector<1x1x1xf32>
    %273 = arith.divf %272, %262 : f32
    %274 = arith.addf %268, %273 : f32
    %c2_86 = arith.constant 2 : index
    %c0_87 = arith.constant 0 : index
    %c0_88 = arith.constant 0 : index
    %275 = vector.load %arg9[%c2_86, %c0_87, %c0_88] : memref<4x16x2xf32, #tpu.memory_space<vmem>>, vector<1x16x2xf32>
    %276 = vector.shape_cast %275 : vector<1x16x2xf32> to vector<16x2xf32>
    %c2_89 = arith.constant 2 : index
    %c0_90 = arith.constant 0 : index
    %c0_91 = arith.constant 0 : index
    %277 = vector.load %arg10[%c2_89, %c0_90, %c0_91] : memref<4x2x16xf32, #tpu.memory_space<vmem>>, vector<1x2x16xf32>
    %278 = vector.shape_cast %277 : vector<1x2x16xf32> to vector<2x16xf32>
    %279 = vector.extract_strided_slice %276 {offsets = [0, 1], sizes = [16, 1], strides = [1, 1]} : vector<16x2xf32> to vector<16x1xf32>
    %280 = vector.extract_strided_slice %276 {offsets = [0, 0], sizes = [16, 1], strides = [1, 1]} : vector<16x2xf32> to vector<16x1xf32>
    %c18 = arith.constant 18 : index
    %281 = memref.load %arg0[%c18] : memref<36xf32, #tpu.memory_space<smem>>
    %c19 = arith.constant 19 : index
    %282 = memref.load %arg0[%c19] : memref<36xf32, #tpu.memory_space<smem>>
    %c20 = arith.constant 20 : index
    %283 = memref.load %arg0[%c20] : memref<36xf32, #tpu.memory_space<smem>>
    %c21 = arith.constant 21 : index
    %284 = memref.load %arg0[%c21] : memref<36xf32, #tpu.memory_space<smem>>
    %c22 = arith.constant 22 : index
    %285 = memref.load %arg0[%c22] : memref<36xf32, #tpu.memory_space<smem>>
    %c23 = arith.constant 23 : index
    %286 = memref.load %arg0[%c23] : memref<36xf32, #tpu.memory_space<smem>>
    %c24 = arith.constant 24 : index
    %287 = memref.load %arg0[%c24] : memref<36xf32, #tpu.memory_space<smem>>
    %c25 = arith.constant 25 : index
    %288 = memref.load %arg0[%c25] : memref<36xf32, #tpu.memory_space<smem>>
    %c26 = arith.constant 26 : index
    %289 = memref.load %arg0[%c26] : memref<36xf32, #tpu.memory_space<smem>>
    %290 = vector.broadcast %281 : f32 to vector<16x1xf32>
    %291 = arith.mulf %290, %279 : vector<16x1xf32>
    %292 = vector.broadcast %282 : f32 to vector<16x1xf32>
    %293 = arith.mulf %292, %280 : vector<16x1xf32>
    %294 = arith.addf %291, %293 : vector<16x1xf32>
    %295 = vector.broadcast %283 : f32 to vector<16x1xf32>
    %296 = arith.addf %294, %295 : vector<16x1xf32>
    %297 = vector.broadcast %284 : f32 to vector<16x1xf32>
    %298 = arith.mulf %297, %279 : vector<16x1xf32>
    %299 = vector.broadcast %285 : f32 to vector<16x1xf32>
    %300 = arith.mulf %299, %280 : vector<16x1xf32>
    %301 = arith.addf %298, %300 : vector<16x1xf32>
    %302 = vector.broadcast %286 : f32 to vector<16x1xf32>
    %303 = arith.addf %301, %302 : vector<16x1xf32>
    %304 = vector.broadcast %287 : f32 to vector<16x1xf32>
    %305 = arith.mulf %304, %279 : vector<16x1xf32>
    %306 = vector.broadcast %288 : f32 to vector<16x1xf32>
    %307 = arith.mulf %306, %280 : vector<16x1xf32>
    %308 = arith.addf %305, %307 : vector<16x1xf32>
    %309 = vector.broadcast %289 : f32 to vector<16x1xf32>
    %310 = arith.addf %308, %309 : vector<16x1xf32>
    %311 = tpu.reciprocal %310 : vector<16x1xf32> -> vector<16x1xf32>
    %312 = arith.mulf %296, %311 : vector<16x1xf32>
    %313 = arith.mulf %303, %311 : vector<16x1xf32>
    %314 = vector.extract_strided_slice %278 {offsets = [0, 0], sizes = [1, 16], strides = [1, 1]} : vector<2x16xf32> to vector<1x16xf32>
    %315 = vector.broadcast %313 : vector<16x1xf32> to vector<16x16xf32>
    %316 = vector.broadcast %314 : vector<1x16xf32> to vector<16x16xf32>
    %317 = arith.subf %315, %316 : vector<16x16xf32>
    %318 = vector.extract_strided_slice %278 {offsets = [1, 0], sizes = [1, 16], strides = [1, 1]} : vector<2x16xf32> to vector<1x16xf32>
    %319 = vector.broadcast %312 : vector<16x1xf32> to vector<16x16xf32>
    %320 = vector.broadcast %318 : vector<1x16xf32> to vector<16x16xf32>
    %321 = arith.subf %319, %320 : vector<16x16xf32>
    %322 = arith.mulf %317, %317 : vector<16x16xf32>
    %323 = arith.mulf %321, %321 : vector<16x16xf32>
    %324 = arith.addf %322, %323 : vector<16x16xf32>
    %cst_92 = arith.constant 6.400000e+01 : f32
    %325 = vector.broadcast %cst_92 : f32 to vector<16x16xf32>
    %326 = arith.cmpf ole, %324, %325 : vector<16x16xf32>
    %327 = vector.extract_strided_slice %106 {offsets = [32, 32], sizes = [16, 16], strides = [1, 1]} : vector<64x64xf32> to vector<16x16xf32>
    %cst_93 = arith.constant 1.000000e+00 : f32
    %328 = vector.broadcast %cst_93 : f32 to vector<16x16xf32>
    %329 = arith.subf %328, %327 : vector<16x16xf32>
    %cst_94 = arith.constant 0.000000e+00 : f32
    %330 = vector.broadcast %cst_94 : f32 to vector<16x16xf32>
    %331 = arith.maximumf %330, %329 : vector<16x16xf32>
    %cst_95 = arith.constant 0.000000e+00 : f32
    %332 = vector.broadcast %cst_95 : f32 to vector<16x16xf32>
    %333 = arith.select %326, %331, %332 : vector<16x16xi1>, vector<16x16xf32>
    %cst_96 = arith.constant 2.000000e-01 : f32
    %334 = vector.broadcast %cst_96 : f32 to vector<16x16xf32>
    %335 = arith.subf %327, %334 : vector<16x16xf32>
    %cst_97 = arith.constant 0.000000e+00 : f32
    %336 = vector.broadcast %cst_97 : f32 to vector<16x16xf32>
    %337 = arith.maximumf %336, %335 : vector<16x16xf32>
    %cst_98 = arith.constant 0.000000e+00 : f32
    %338 = vector.broadcast %cst_98 : f32 to vector<16x16xf32>
    %339 = arith.select %326, %338, %337 : vector<16x16xi1>, vector<16x16xf32>
    %340 = arith.extui %326 : vector<16x16xi1> to vector<16x16xi32>
    %341 = arith.sitofp %340 : vector<16x16xi32> to vector<16x16xf32>
    %342 = vector.shape_cast %341 : vector<16x16xf32> to vector<1x16x16xf32>
    %cst_99 = arith.constant dense<0.000000e+00> : vector<1xf32>
    %343 = vector.multi_reduction <add>, %342, %cst_99 [1, 2] : vector<1x16x16xf32> to vector<1xf32>
    %344 = vector.shape_cast %343 : vector<1xf32> to vector<1x1x1xf32>
    %345 = vector.extract %344[0, 0, 0] : f32 from vector<1x1x1xf32>
    %cst_100 = arith.constant 2.560000e+02 : f32
    %346 = arith.subf %cst_100, %345 : f32
    %347 = vector.shape_cast %333 : vector<16x16xf32> to vector<1x16x16xf32>
    %cst_101 = arith.constant dense<0.000000e+00> : vector<1xf32>
    %348 = vector.multi_reduction <add>, %347, %cst_101 [1, 2] : vector<1x16x16xf32> to vector<1xf32>
    %349 = vector.shape_cast %348 : vector<1xf32> to vector<1x1x1xf32>
    %350 = vector.extract %349[0, 0, 0] : f32 from vector<1x1x1xf32>
    %351 = arith.divf %350, %345 : f32
    %352 = arith.addf %274, %351 : f32
    %353 = vector.shape_cast %339 : vector<16x16xf32> to vector<1x16x16xf32>
    %cst_102 = arith.constant dense<0.000000e+00> : vector<1xf32>
    %354 = vector.multi_reduction <add>, %353, %cst_102 [1, 2] : vector<1x16x16xf32> to vector<1xf32>
    %355 = vector.shape_cast %354 : vector<1xf32> to vector<1x1x1xf32>
    %356 = vector.extract %355[0, 0, 0] : f32 from vector<1x1x1xf32>
    %357 = arith.divf %356, %346 : f32
    %358 = arith.addf %352, %357 : f32
    %c3_103 = arith.constant 3 : index
    %c0_104 = arith.constant 0 : index
    %c0_105 = arith.constant 0 : index
    %359 = vector.load %arg9[%c3_103, %c0_104, %c0_105] : memref<4x16x2xf32, #tpu.memory_space<vmem>>, vector<1x16x2xf32>
    %360 = vector.shape_cast %359 : vector<1x16x2xf32> to vector<16x2xf32>
    %c3_106 = arith.constant 3 : index
    %c0_107 = arith.constant 0 : index
    %c0_108 = arith.constant 0 : index
    %361 = vector.load %arg10[%c3_106, %c0_107, %c0_108] : memref<4x2x16xf32, #tpu.memory_space<vmem>>, vector<1x2x16xf32>
    %362 = vector.shape_cast %361 : vector<1x2x16xf32> to vector<2x16xf32>
    %363 = vector.extract_strided_slice %360 {offsets = [0, 1], sizes = [16, 1], strides = [1, 1]} : vector<16x2xf32> to vector<16x1xf32>
    %364 = vector.extract_strided_slice %360 {offsets = [0, 0], sizes = [16, 1], strides = [1, 1]} : vector<16x2xf32> to vector<16x1xf32>
    %c27 = arith.constant 27 : index
    %365 = memref.load %arg0[%c27] : memref<36xf32, #tpu.memory_space<smem>>
    %c28 = arith.constant 28 : index
    %366 = memref.load %arg0[%c28] : memref<36xf32, #tpu.memory_space<smem>>
    %c29 = arith.constant 29 : index
    %367 = memref.load %arg0[%c29] : memref<36xf32, #tpu.memory_space<smem>>
    %c30 = arith.constant 30 : index
    %368 = memref.load %arg0[%c30] : memref<36xf32, #tpu.memory_space<smem>>
    %c31 = arith.constant 31 : index
    %369 = memref.load %arg0[%c31] : memref<36xf32, #tpu.memory_space<smem>>
    %c32 = arith.constant 32 : index
    %370 = memref.load %arg0[%c32] : memref<36xf32, #tpu.memory_space<smem>>
    %c33 = arith.constant 33 : index
    %371 = memref.load %arg0[%c33] : memref<36xf32, #tpu.memory_space<smem>>
    %c34 = arith.constant 34 : index
    %372 = memref.load %arg0[%c34] : memref<36xf32, #tpu.memory_space<smem>>
    %c35 = arith.constant 35 : index
    %373 = memref.load %arg0[%c35] : memref<36xf32, #tpu.memory_space<smem>>
    %374 = vector.broadcast %365 : f32 to vector<16x1xf32>
    %375 = arith.mulf %374, %363 : vector<16x1xf32>
    %376 = vector.broadcast %366 : f32 to vector<16x1xf32>
    %377 = arith.mulf %376, %364 : vector<16x1xf32>
    %378 = arith.addf %375, %377 : vector<16x1xf32>
    %379 = vector.broadcast %367 : f32 to vector<16x1xf32>
    %380 = arith.addf %378, %379 : vector<16x1xf32>
    %381 = vector.broadcast %368 : f32 to vector<16x1xf32>
    %382 = arith.mulf %381, %363 : vector<16x1xf32>
    %383 = vector.broadcast %369 : f32 to vector<16x1xf32>
    %384 = arith.mulf %383, %364 : vector<16x1xf32>
    %385 = arith.addf %382, %384 : vector<16x1xf32>
    %386 = vector.broadcast %370 : f32 to vector<16x1xf32>
    %387 = arith.addf %385, %386 : vector<16x1xf32>
    %388 = vector.broadcast %371 : f32 to vector<16x1xf32>
    %389 = arith.mulf %388, %363 : vector<16x1xf32>
    %390 = vector.broadcast %372 : f32 to vector<16x1xf32>
    %391 = arith.mulf %390, %364 : vector<16x1xf32>
    %392 = arith.addf %389, %391 : vector<16x1xf32>
    %393 = vector.broadcast %373 : f32 to vector<16x1xf32>
    %394 = arith.addf %392, %393 : vector<16x1xf32>
    %395 = tpu.reciprocal %394 : vector<16x1xf32> -> vector<16x1xf32>
    %396 = arith.mulf %380, %395 : vector<16x1xf32>
    %397 = arith.mulf %387, %395 : vector<16x1xf32>
    %398 = vector.extract_strided_slice %362 {offsets = [0, 0], sizes = [1, 16], strides = [1, 1]} : vector<2x16xf32> to vector<1x16xf32>
    %399 = vector.broadcast %397 : vector<16x1xf32> to vector<16x16xf32>
    %400 = vector.broadcast %398 : vector<1x16xf32> to vector<16x16xf32>
    %401 = arith.subf %399, %400 : vector<16x16xf32>
    %402 = vector.extract_strided_slice %362 {offsets = [1, 0], sizes = [1, 16], strides = [1, 1]} : vector<2x16xf32> to vector<1x16xf32>
    %403 = vector.broadcast %396 : vector<16x1xf32> to vector<16x16xf32>
    %404 = vector.broadcast %402 : vector<1x16xf32> to vector<16x16xf32>
    %405 = arith.subf %403, %404 : vector<16x16xf32>
    %406 = arith.mulf %401, %401 : vector<16x16xf32>
    %407 = arith.mulf %405, %405 : vector<16x16xf32>
    %408 = arith.addf %406, %407 : vector<16x16xf32>
    %cst_109 = arith.constant 6.400000e+01 : f32
    %409 = vector.broadcast %cst_109 : f32 to vector<16x16xf32>
    %410 = arith.cmpf ole, %408, %409 : vector<16x16xf32>
    %411 = vector.extract_strided_slice %106 {offsets = [48, 48], sizes = [16, 16], strides = [1, 1]} : vector<64x64xf32> to vector<16x16xf32>
    %cst_110 = arith.constant 1.000000e+00 : f32
    %412 = vector.broadcast %cst_110 : f32 to vector<16x16xf32>
    %413 = arith.subf %412, %411 : vector<16x16xf32>
    %cst_111 = arith.constant 0.000000e+00 : f32
    %414 = vector.broadcast %cst_111 : f32 to vector<16x16xf32>
    %415 = arith.maximumf %414, %413 : vector<16x16xf32>
    %cst_112 = arith.constant 0.000000e+00 : f32
    %416 = vector.broadcast %cst_112 : f32 to vector<16x16xf32>
    %417 = arith.select %410, %415, %416 : vector<16x16xi1>, vector<16x16xf32>
    %cst_113 = arith.constant 2.000000e-01 : f32
    %418 = vector.broadcast %cst_113 : f32 to vector<16x16xf32>
    %419 = arith.subf %411, %418 : vector<16x16xf32>
    %cst_114 = arith.constant 0.000000e+00 : f32
    %420 = vector.broadcast %cst_114 : f32 to vector<16x16xf32>
    %421 = arith.maximumf %420, %419 : vector<16x16xf32>
    %cst_115 = arith.constant 0.000000e+00 : f32
    %422 = vector.broadcast %cst_115 : f32 to vector<16x16xf32>
    %423 = arith.select %410, %422, %421 : vector<16x16xi1>, vector<16x16xf32>
    %424 = arith.extui %410 : vector<16x16xi1> to vector<16x16xi32>
    %425 = arith.sitofp %424 : vector<16x16xi32> to vector<16x16xf32>
    %426 = vector.shape_cast %425 : vector<16x16xf32> to vector<1x16x16xf32>
    %cst_116 = arith.constant dense<0.000000e+00> : vector<1xf32>
    %427 = vector.multi_reduction <add>, %426, %cst_116 [1, 2] : vector<1x16x16xf32> to vector<1xf32>
    %428 = vector.shape_cast %427 : vector<1xf32> to vector<1x1x1xf32>
    %429 = vector.extract %428[0, 0, 0] : f32 from vector<1x1x1xf32>
    %cst_117 = arith.constant 2.560000e+02 : f32
    %430 = arith.subf %cst_117, %429 : f32
    %431 = vector.shape_cast %417 : vector<16x16xf32> to vector<1x16x16xf32>
    %cst_118 = arith.constant dense<0.000000e+00> : vector<1xf32>
    %432 = vector.multi_reduction <add>, %431, %cst_118 [1, 2] : vector<1x16x16xf32> to vector<1xf32>
    %433 = vector.shape_cast %432 : vector<1xf32> to vector<1x1x1xf32>
    %434 = vector.extract %433[0, 0, 0] : f32 from vector<1x1x1xf32>
    %435 = arith.divf %434, %429 : f32
    %436 = arith.addf %358, %435 : f32
    %437 = vector.shape_cast %423 : vector<16x16xf32> to vector<1x16x16xf32>
    %cst_119 = arith.constant dense<0.000000e+00> : vector<1xf32>
    %438 = vector.multi_reduction <add>, %437, %cst_119 [1, 2] : vector<1x16x16xf32> to vector<1xf32>
    %439 = vector.shape_cast %438 : vector<1xf32> to vector<1x1x1xf32>
    %440 = vector.extract %439[0, 0, 0] : f32 from vector<1x1x1xf32>
    %441 = arith.divf %440, %430 : f32
    %442 = arith.addf %436, %441 : f32
    %cst_120 = arith.constant 2.500000e-01 : f32
    %443 = arith.mulf %442, %cst_120 : f32
    %cst_121 = arith.constant 1.000000e-01 : f32
    %444 = arith.mulf %46, %cst_121 : f32
    %cst_122 = arith.constant 1.000000e+01 : f32
    %445 = arith.mulf %103, %cst_122 : f32
    %cst_123 = arith.constant 1.000000e-03 : f32
    %446 = arith.mulf %443, %cst_123 : f32
    %447 = arith.addf %68, %444 : f32
    %448 = arith.addf %447, %445 : f32
    %449 = arith.addf %448, %446 : f32
    %c0_124 = arith.constant 0 : index
    %450 = memref.load %arg13[%c0_124] : memref<5xf32, #tpu.memory_space<smem>>
    memref.store %449, %arg13[%c0_124] : memref<5xf32, #tpu.memory_space<smem>>
    %c1_125 = arith.constant 1 : index
    %451 = memref.load %arg13[%c1_125] : memref<5xf32, #tpu.memory_space<smem>>
    memref.store %68, %arg13[%c1_125] : memref<5xf32, #tpu.memory_space<smem>>
    %c2_126 = arith.constant 2 : index
    %452 = memref.load %arg13[%c2_126] : memref<5xf32, #tpu.memory_space<smem>>
    memref.store %444, %arg13[%c2_126] : memref<5xf32, #tpu.memory_space<smem>>
    %c3_127 = arith.constant 3 : index
    %453 = memref.load %arg13[%c3_127] : memref<5xf32, #tpu.memory_space<smem>>
    memref.store %445, %arg13[%c3_127] : memref<5xf32, #tpu.memory_space<smem>>
    %c4_128 = arith.constant 4 : index
    %454 = memref.load %arg13[%c4_128] : memref<5xf32, #tpu.memory_space<smem>>
    memref.store %446, %arg13[%c4_128] : memref<5xf32, #tpu.memory_space<smem>>
    return
  }
}

</mosaic_0001>

<bundles_post_ra>
// kernel: tpu_custom_call.1
= control target key start
LH: loop header
LB: loop body
LE: loop exit
PB: predicated region body
PF: predicated region fallthrough
CT: control target
= control target key end

     0   :  { %18 = vsyncpa [#allocation4], 0  ;;  %s2153_s0 = inlined_call_operand.vmem [shape: f32[36], index: 0, kind: input, shape index: {}]   ;;  %s2154_s1 = inlined_call_operand.vmem [shape: f32[4,32], index: 1, kind: input, shape index: {}]   ;;  %s2155_s2 = inlined_call_operand.vmem [shape: f32[4,32], index: 2, kind: input, shape index: {}]   ;;  %s2156_s3 = inlined_call_operand.vmem [shape: f32[32,64], index: 3, kind: input, shape index: {}]   ;;  %s2157_s4 = inlined_call_operand.vmem [shape: f32[4,64], index: 4, kind: input, shape index: {}]   ;;  %s2158_s5 = inlined_call_operand.vmem [shape: f32[4,256], index: 5, kind: input, shape index: {}]   ;;  %s2159_s6 = inlined_call_operand.vmem [shape: f32[4,256], index: 6, kind: input, shape index: {}]   ;;  %s2160_s7 = inlined_call_operand.vmem [shape: f32[4,256], index: 7, kind: input, shape index: {}]   ;;  %s2161_s8 = inlined_call_operand.vmem [shape: f32[4,256], index: 8, kind: input, shape index: {}]   ;;  %s2162_s9 = inlined_call_operand.vmem [shape: f32[4,16,2], index: 9, kind: input, shape index: {}]   ;;  %s2163_s10 = inlined_call_operand.vmem [shape: f32[4,2,16], index: 10, kind: input, shape index: {}]   ;;  %s2164_s11 = inlined_call_operand.vmem [shape: f32[64,32], index: 11, kind: input, shape index: {}]   ;;  %s2165_s12 = inlined_call_operand.vmem [shape: f32[32,64], index: 12, kind: input, shape index: {}]   ;;  %s2166_s13 = inlined_call_operand.hbm [shape: f32[5], index: 13, kind: output, shape index: {}]  }
   0x1   :  { %19 = vsyncpa [#allocation3], 0  ;;  %s26_s27 = sshll.u32 %s2153_s0, 4  ;;  %s27_s27 = int_to_ptr.vmem [resolvable:$true] %s26_s27 }
   0x2   :  { %s1511_s28 = scalar_lea.vmem %s27_s27, 16  ;;  %p1516_p1 = scmp.lt.s32.totalorder %s27_s27, %s27_s27 }
   0x3   :  { %p1512_p0 = scmp.ne.s32.totalorder %s27_s27, %s1511_s28  ;;  %p1517_p2 = scmp.lt.s32.totalorder %s1511_s28, %s1511_s28 }
   0x5   :  { %p1518_p3 = por %p1517_p2, %p1516_p1 }
   0x7   :  { %p1519_p4 = pnand %p1518_p3, %p1512_p0 }
   0x9   :  { %1522 = shalt.err (!%p1519_p4)
}
   0xa   :  { %s1537_s29 = smov [#allocation2]  }
   0xb   :  { %29 = dma.vmem_to_smem %s27_s27, 16, %s1537_s29, [#allocation4]  }
   0xc   :  { %1533 = dma.done.wait [#allocation4], 16  }
   0xd   :  { %1534 = vsyncadd [#allocation4], 4294967280 }
   0xe   :  { %57 = sfence }
   0xf   :  { %s1275_s30 = sld [smem:[#allocation2 + $0x7]]  ;;  %s1620_s14 = sld [smem:[#allocation2 + $0x1]]  ;;  %v85_v0 = vld [vmem:[%s2156_s3] sm:$0xff]  ;;  %v86_v1 = vld [vmem:[%s2156_s3 + $0x8] sm:$0xff]  ;;  %v1538_v2 = vmov 0.0|0.0   ;;  %v87_v4 = vld [vmem:[%s2156_s3 + $0x10] sm:$0xff] }
  0x10   :  { %s1622_s15 = sld [smem:[#allocation2 + $0x4]]  ;;  %1377 = vmatprep.subr.bf16.mxu0 %v1538_v2  ;;  %v1378_v3 = vpack.c.bf16 %v86_v1, %v85_v0  ;;  %v88_v5 = vld [vmem:[%s2156_s3 + $0x18] sm:$0xff]  ;;  %v327_v6 = vld [vmem:[%s2165_s12] sm:$0xff]  ;;  %vm1539_vm0 = vmmov 0   ;;  %v1540_v8 = vmov 0.0   ;;  %v328_v9 = vld [vmem:[%s2165_s12 + $0x8] sm:$0xff] }
  0x11   :  { %v1642_v7 = vld [vmem:[%s2162_s9] sm:$0xff]  ;;  %1354 = vmatprep.mubr.msk.f32.mxu0 %vm1539_vm0, %v1540_v8  ;;  %v1381_v10 = vpack.c.bf16 %v88_v5, %v87_v4  ;;  %v1383_v11 = vpack.c.bf16 %v328_v9, %v327_v6  ;;  %v1651_v12 = vld [vmem:[%s2162_s9 + $0x8] sm:$0xff]  ;;  %v329_v14 = vld [vmem:[%s2165_s12 + $0x10] sm:$0xff]  ;;  %vm89_vm1 = vcmask 261120   ;;  %v1542_v28 = vmov 1   ;;  %s1291_s27 = sld [smem:[#allocation2 + $0x10]] }
  0x12   :  { %1379 = vmatpush3.bf16.msra.mxu0 %v1378_v3  ;;  %v330_v15 = vld [vmem:[%s2165_s12 + $0x18] sm:$0xff]  ;;  %v58_v23 = vld [vmem:[%s2154_s1] sm:$0xf]  ;;  %v320_v27 = vld [vmem:[%s2164_s11 + $0x8] sm:$0xff]  ;;  %1457 = vset.pattern.permute.xlu1 %v1542_v28  ;;  %vm60_vm2 = vcmask 257024   ;;  %s1285_s28 = sld [smem:[#allocation2 + $0xa]] }
  0x13   :  { %1380 = vmatprep.subr.bf16.mxu0 %v1538_v2  ;;  %1391 = vmatprep.subr.bf16.mxu1 %v1383_v11  ;;  %v1387_v20 = vpack.c.bf16 %v330_v15, %v329_v14  ;;  %v319_v24 = vld [vmem:[%s2164_s11] sm:$0xff]  ;;  %v321_v29 = vld [vmem:[%s2164_s11 + $0x10] sm:$0xff]  ;;  %v322_v30 = vld [vmem:[%s2164_s11 + $0x18] sm:$0xff]  ;;  %v59_v35 = vmul.f32 %v58_v23, %v58_v23  ;;  %s1288_s16 = sld [smem:[#allocation2 + $0xd]]  ;;  %s1307_s17 = sld [smem:[#allocation2 + $0x19]]  ;;  %vm271_vm3 = vcmask 1043456  }
  0x14   :  { %1393 = vmatpush3.bf16.msra.mxu1 %v1383_v11  ;;  %1458 = vset.pattern.permute.xlu0 %v1542_v28  ;;  %v196_v31 = vld [vmem:[%s2155_s2] sm:$0xf]  ;;  %v1699_v38 = vld [vmem:[%s2162_s9 + $0x18] sm:$0xff]  ;;  %v1705_v41 = vld [vmem:[%s2162_s9 + $0x10] sm:$0xff]  ;;  %s1301_s18 = sld [smem:[#allocation2 + $0x13]]  ;;  %s1304_s19 = sld [smem:[#allocation2 + $0x16]] }
  0x15   :  { %v513_v13 = vstv %s1275_s30  ;;  %v475_v17 = vstv %s1620_s14  ;;  %s1541_s30 = smov 1   ;;  %1392 = vmatprep.subr.bf16.mxu1 %v1387_v20  ;;  %1368 = vmatprep.mubr.msk.f32.mxu1 %vm89_vm1, %v321_v29  ;;  %v222_v32 = vmul.f32 %v196_v31, %v58_v23  ;;  %v197_v34 = vmul.f32 %v196_v31, %v196_v31  ;;  %v1717_v48 = vld [vmem:[%s2162_s9 + $0x28] sm:$0xff]  ;;  %v1726_v52 = vld [vmem:[%s2162_s9 + $0x20] sm:$0xff]  ;;  %s1274_s29 = sld [smem:[#allocation2 + $0x6]] }
  0x16   :  { %v514_v16 = vmul.f32 %v513_v13, %v1642_v7  ;;  %v476_v18 = vmul.f32 %v475_v17, %v1642_v7  ;;  %v515_v19 = vmul.f32 %v513_v13, %v1651_v12  ;;  %1382 = vmatpush3.bf16.msra.mxu0 %v1381_v10  ;;  %v477_v21 = vmul.f32 %v475_v17, %v1651_v12  ;;  %v288_v55 = vld [vmem:[%s2160_s7] sm:$0xff]  ;;  %v324_v1 = vld [vmem:[%s2164_s11 + $0x28] sm:$0xff]  ;;  %s1323_s2 = sld [smem:[#allocation2 + $0x22]]  ;;  %s1273_s0 = sld [smem:[#allocation2 + $0x5]] }
  0x17   :  { %v494_v22 = vstv %s1622_s15  ;;  %1384 = vmatprep.subr.bf16.mxu0 %v1383_v11  ;;  %v223_v33 = vsel %vm60_vm2, %v222_v32, 0.0  ;;  %v198_v36 = vsel %vm60_vm2, %v197_v34, 0.0  ;;  %v61_v37 = vsel %vm60_vm2, %v59_v35, 0.0  ;;  %v257_v58 = vld [vmem:[%s2158_s5] sm:$0xff]  ;;  %s1292_s20 = sld [smem:[#allocation2 + $0x11]]  ;;  %s1785_s1 = sld [smem:[#allocation2 + $0xc]] }
  0x18   :  { %518 = vrot.lane.b32.xlu0 %v514_v16, %s1541_s30  ;;  %480 = vrot.lane.b32.xlu1 %v476_v18, %s1541_s30  ;;  %v495_v25 = vmul.f32 %v494_v22, %v1642_v7  ;;  %v496_v26 = vmul.f32 %v494_v22, %v1651_v12  ;;  %v694_v39 = vstv %s1291_s27  ;;  %v656_v42 = vstv %s1285_s28  ;;  %s1790_s15 = sld [smem:[#allocation2 + $0x18]]  ;;  %s1284_s21 = sld [smem:[#allocation2 + $0x9]] }
  0x19   :  { %1355 = vmatmul.mubr.msk.f32.vlgmr.msra.gmra.mrb[0].mxu0 %vm89_vm1, %v58_v23  ;;  %1394 = vmatpush3.bf16.msra.mxu1 %v1387_v20  ;;  %v696_v40 = vmul.f32 %v1699_v38, %v694_v39  ;;  %v695_v43 = vmul.f32 %v1705_v41, %v694_v39  ;;  %v658_v44 = vmul.f32 %v1699_v38, %v656_v42  ;;  %v675_v45 = vstv %s1288_s16  ;;  %v323_v0 = vld [vmem:[%s2164_s11 + $0x20] sm:$0xff]  ;;  %s463_s16 = sld [smem:[#allocation2]]  ;;  %s1793_s22 = sld [smem:[#allocation2 + $0xe]] }
  0x1a   :  { %1386 = vmatpush3.bf16.msra.mxu0 %v1383_v11  ;;  %1365 = vmatprep.mubr.msk.f32.mxu0 %vm89_vm1, %v319_v24  ;;  %v657_v46 = vmul.f32 %v1705_v41, %v656_v42  ;;  %v677_v47 = vmul.f32 %v1699_v38, %v675_v45  ;;  %v890_v49 = vstv %s1307_s17  ;;  %v676_v50 = vmul.f32 %v1705_v41, %v675_v45  ;;  %v289_v4 = vld [vmem:[%s2161_s8] sm:$0xff]  ;;  %s1276_s8 = sld [smem:[#allocation2 + $0x8]]  ;;  %s1270_s17 = sld [smem:[#allocation2 + $0x2]] }
  0x1b   :  { %1388 = vmatprep.subr.bf16.mxu0 %v1387_v20  ;;  %v892_v51 = vmul.f32 %v1717_v48, %v890_v49  ;;  %v852_v53 = vstv %s1301_s18  ;;  %v891_v54 = vmul.f32 %v1726_v52, %v890_v49  ;;  %v871_v57 = vstv %s1304_s19  ;;  %v258_v9 = vld [vmem:[%s2159_s6] sm:$0xff]  ;;  %s1271_s6 = sld [smem:[#allocation2 + $0x3]]  ;;  %s1795_s23 = sld [smem:[#allocation2 + $0x1a]] }
  0x1c   :  { %520 = vrot.lane.b32.xlu0 %v515_v19, %s1541_s30  ;;  %482 = vrot.lane.b32.xlu1 %v477_v21, %s1541_s30  ;;  %v854_v56 = vmul.f32 %v1717_v48, %v852_v53  ;;  %v294_v59 = vsub.f32 1.0, %v288_v55  ;;  %v853_v60 = vmul.f32 %v1726_v52, %v852_v53  ;;  %v873_v61 = vmul.f32 %v1717_v48, %v871_v57  ;;  %s1800_s5 = sld [smem:[#allocation2 + $0x15]]  ;;  %s1802_s7 = sld [smem:[#allocation2 + $0xb]] }
  0x1d   :  { %1369 = vmatmul.mubr.msk.f32.vlgmr.msra.gmra.mrb[0].mxu1 %vm89_vm1, %v322_v30  ;;  %v263_v62 = vsub.f32 1.0, %v257_v58  ;;  %1459 = vlog2.f32 %v288_v55  ;;  %v872_v63 = vmul.f32 %v1726_v52, %v871_v57  ;;  %v293_v11 = vsub.f32 1.0, %v289_v4  ;;  %s1804_s24 = sld [smem:[#allocation2 + $0x12]]  ;;  %s1813_s25 = sld [smem:[#allocation2 + $0x17]] }
  0x1e   :  { %1390 = vmatpush3.bf16.msra.mxu0 %v1387_v20  ;;  %1461 = vlog2.f32 %v294_v59  ;;  %1371 = vmatprep.mubr.msk.f32.mxu1 %vm89_vm1, %v323_v0  ;;  %v262_v15 = vsub.f32 1.0, %v258_v9  ;;  %v507_v59 = vstv %s1273_s0  ;;  %s1818_s26 = sld [smem:[#allocation2 + $0x14]]  ;;  %s1837_s28 = sld [smem:[#allocation2 + $0x1f]]  ;;  %vm73_vm5 = vcmask 3072  }
  0x1f   :  { %1463 = vlog2.f32 %v257_v58  ;;  %v472_v49 = vstv %s463_s16  ;;  %v1774_v58 = vld [vmem:[%s2162_s9 + $0x30] sm:$0xff]  ;;  %s1829_s27 = sld [smem:[#allocation2 + $0x1c]]  ;;  %vm591_vm11 = vcmask 130048   ;;  %s1937_s0 = sld [smem:[#allocation2 + $0x1e]]  ;;  %vm182_vm2 = vcmask 519168  }
  0x20   :  { %499 = vrot.lane.b32.xlu0 %v495_v25, %s1541_s30  ;;  %501 = vrot.lane.b32.xlu1 %v496_v26, %s1541_s30  ;;  %1465 = vlog2.f32 %v263_v62  ;;  %v473_v55 = vmul.f32 %v472_v49, %v1642_v7  ;;  %v474_v0 = vmul.f32 %v472_v49, %v1651_v12  ;;  %s1955_s19 = sld [smem:[#allocation2 + $0x20]] }
  0x21   :  { %1366 = vmatmul.mubr.msk.f32.vlgmr.msra.gmra.mrb[2].mxu0 %vm89_vm1, %v320_v27  ;;  %1372 = vmatmul.mubr.msk.f32.gmra.mrb[2].mxu1 %vm89_vm1, %v324_v1  ;;  %v510_v27 = vstv %s1274_s29 }
  0x22   :  { %v511_v32 = vmul.f32 %v510_v27, %v1642_v7  ;;  %v512_v34 = vmul.f32 %v510_v27, %v1651_v12 }
  0x27   :  { %v1460_v2 = vpop.eup %1459 }
  0x28   :  { %v1462_v3 = vpop.eup %1461  ;;  %v291_v10 = vmul.f32 0.6931472, %v1460_v2 }
  0x29   :  { %v1464_v5 = vpop.eup %1463  ;;  %v296_v13 = vmul.f32 0.6931472, %v1462_v3 }
  0x2a   :  { %v1466_v6 = vpop.eup %1465  ;;  %v260_v14 = vmul.f32 0.6931472, %v1464_v5  ;;  %v292_v17 = vmul.f32 %v291_v10, %v289_v4 }
  0x2b   :  { %v265_v16 = vmul.f32 0.6931472, %v1466_v6  ;;  %v297_v18 = vmul.f32 %v296_v13, %v293_v11 }
  0x2c   :  { %v261_v19 = vmul.f32 %v260_v14, %v258_v9 }
  0x2d   :  { %v266_v20 = vmul.f32 %v265_v16, %v262_v15  ;;  %v298_v21 = vadd.f32 %v297_v18, %v292_v17 }
  0x2f   :  { %v267_v22 = vadd.f32 %v266_v20, %v261_v19  ;;  %v300_v23 = vcombine.high %v298_v21, %v298_v21  ;;  %v302_v25 = vsel %vm271_vm3, %v298_v21, 0.0 }
  0x31   :  { %v269_v24 = vcombine.high %v267_v22, %v267_v22  ;;  %v303_v26 = vsel %vm271_vm3, %v300_v23, 0.0  ;;  %v272_v28 = vsel %vm271_vm3, %v267_v22, 0.0  ;;  %v707_v23 = vstv %s1292_s20  ;;  %s1545_s20 = smov 80  }
  0x32   :  { %v304_v30 = vadd.f32 %v303_v26, %v302_v25 }
  0x33   :  { %v273_v29 = vsel %vm271_vm3, %v269_v24, 0.0 }
  0x3f   :  { %224 = vadd.xlane.f32.xlu0 %v223_v33  ;;  %v274_v33 = vadd.f32 %v273_v29, %v272_v28 }
  0x43   :  { %199 = vadd.xlane.f32.xlu0 %v198_v36 }
  0x44   :  { %62 = vadd.xlane.f32.xlu1 %v61_v37  ;;  %v526_v37 = vstv %s1276_s8  ;;  %s1926_s8 = sld [smem:[#allocation2 + $0x21]] }
  0x55   :  { %701 = vrot.lane.b32.xlu1 %v696_v40, %s1541_s30 }
  0x59   :  { %699 = vrot.lane.b32.xlu0 %v695_v43, %s1541_s30  ;;  %663 = vrot.lane.b32.xlu1 %v658_v44, %s1541_s30  ;;  %v491_v44 = vstv %s1271_s6  ;;  %s1928_s6 = sld [smem:[#allocation2 + $0x23]] }
  0x5d   :  { %661 = vrot.lane.b32.xlu0 %v657_v46, %s1541_s30  ;;  %682 = vrot.lane.b32.xlu1 %v677_v47, %s1541_s30  ;;  %v492_v46 = vmul.f32 %v491_v44, %v1642_v7  ;;  %v488_v7 = vstv %s1270_s17 }
  0x61   :  { %680 = vrot.lane.b32.xlu0 %v676_v50, %s1541_s30  ;;  %897 = vrot.lane.b32.xlu1 %v892_v51, %s1541_s30  ;;  %v1766_v50 = vld [vmem:[%s2162_s9 + $0x38] sm:$0xff]  ;;  %v1086_v51 = vstv %s1323_s2  ;;  %s1290_s9 = sld [smem:[#allocation2 + $0xf]]  ;;  %s1935_s2 = sld [smem:[#allocation2 + $0x1b]] }
  0x62   :  { %v1088_v57 = vmul.f32 %v1766_v50, %v1086_v51  ;;  %v1087_v62 = vmul.f32 %v1774_v58, %v1086_v51 }
  0x65   :  { %895 = vrot.lane.b32.xlu0 %v891_v54, %s1541_s30  ;;  %859 = vrot.lane.b32.xlu1 %v854_v56, %s1541_s30  ;;  %v493_v54 = vmul.f32 %v491_v44, %v1651_v12 }
  0x67   :  { %v691_v15 = vstv %s1290_s9  ;;  %s1543_s9 = smov 112  }
  0x68   :  { %v692_v19 = vmul.f32 %v1705_v41, %v691_v15  ;;  %v693_v22 = vmul.f32 %v1699_v38, %v691_v15 }
  0x69   :  { %857 = vrot.lane.b32.xlu0 %v853_v60, %s1541_s30  ;;  %878 = vrot.lane.b32.xlu1 %v873_v61, %s1541_s30 }
  0x6d   :  { %876 = vrot.lane.b32.xlu0 %v872_v63, %s1541_s30 }
  0x8a   :  { %v519_v31 = vpop.permute.xlu0 %518  ;;  %v481_v39 = vpop.permute.xlu1 %480 }
  0x8b   :  { %v524_v35 = vadd.f32 %v519_v31, %v511_v32  ;;  %v486_v63 = vadd.f32 %v481_v39, %v473_v55 }
  0x8c   :  { %305 = vadd.xlane.f32.xlu0 %v304_v30  ;;  %v672_v30 = vstv %s1785_s1 }
  0x8d   :  { %275 = vadd.xlane.f32.xlu1 %v274_v33  ;;  %v527_v42 = vadd.f32 %v526_v37, %v524_v35  ;;  %v489_v5 = vadd.f32 %v488_v7, %v486_v63  ;;  %v673_v32 = vmul.f32 %v1705_v41, %v672_v30  ;;  %v653_v35 = vstv %s1284_s21 }
  0x8e   :  { %v521_v36 = vpop.permute.xlu0 %520  ;;  %v483_v45 = vpop.permute.xlu1 %482  ;;  %v674_v39 = vmul.f32 %v1699_v38, %v672_v30  ;;  %v849_v63 = vstv %s1804_s24  ;;  %v865_v30 = vstv %s1818_s26 }
  0x8f   :  { %v525_v40 = vadd.f32 %v521_v36, %v512_v34  ;;  %1467 = vrcp.f32 %v527_v42  ;;  %v487_v6 = vadd.f32 %v483_v45, %v474_v0  ;;  %v887_v34 = vstv %s1790_s15  ;;  %s1544_s15 = smov 96  }
  0x90   :  { %v654_v36 = vmul.f32 %v1705_v41, %v653_v35  ;;  %v888_v42 = vmul.f32 %v1726_v52, %v887_v34  ;;  %v655_v45 = vmul.f32 %v1699_v38, %v653_v35  ;;  %v889_v49 = vmul.f32 %v1717_v48, %v887_v34 }
  0x91   :  { %v528_v43 = vadd.f32 %v526_v37, %v525_v40  ;;  %v490_v11 = vadd.f32 %v488_v7, %v487_v6 }
  0x92   :  { %v500_v47 = vpop.permute.xlu0 %499  ;;  %v502_v56 = vpop.permute.xlu1 %501 }
  0x93   :  { %1469 = vrcp.f32 %v528_v43  ;;  %v505_v53 = vadd.f32 %v500_v47, %v492_v46  ;;  %v506_v61 = vadd.f32 %v502_v56, %v493_v54  ;;  %v688_v46 = vstv %s1793_s22 }
  0x94   :  { %v903_v47 = vstv %s1795_s23 }
  0x95   :  { %v508_v60 = vadd.f32 %v507_v59, %v505_v53  ;;  %v509_v4 = vadd.f32 %v507_v59, %v506_v61  ;;  %v868_v59 = vstv %s1800_s5  ;;  %v669_v61 = vstv %s1802_s7 }
  0x96   :  { %v869_v6 = vmul.f32 %v1726_v52, %v868_v59 }
  0x99   :  { %v1468_v1 = vpop.eup %1467 }
  0x9a   :  { %v533_v3 = vmul.f32 %v1468_v1, %v508_v60  ;;  %v531_v10 = vmul.f32 %v1468_v1, %v489_v5 }
  0x9d   :  { %v1470_v2 = vpop.eup %1469 }
  0x9e   :  { %1093 = vrot.lane.b32.xlu1 %v1088_v57, %s1541_s30  ;;  %v534_v9 = vmul.f32 %v1470_v2, %v509_v4  ;;  %v532_v13 = vmul.f32 %v1470_v2, %v490_v11 }
  0xa2   :  { %1091 = vrot.lane.b32.xlu0 %v1087_v62, %s1541_s30  ;;  %537 = vperm.xlu1 %1457, %v533_v3  }
  0xa6   :  { %542 = vperm.xlu0 %1458, %v534_v9   ;;  %553 = vperm.xlu1 %1457, %v531_v10   ;;  %v850_v10 = vmul.f32 %v1726_v52, %v849_v63 }
  0xaa   :  { %558 = vperm.xlu1 %1457, %v532_v13  }
  0xcc   :  { %v225_v12 = vpop.xlane.xlu0 %224 }
  0xcd   :  { %v1780_v14 = vmul.f32 2.0, %v225_v12  ;;  %v870_v12 = vmul.f32 %v1717_v48, %v868_v59 }
  0xcf   :  { %v229_v16 = vand.u32 2147483647, %v1780_v14 }
  0xd0   :  { %v1783_v17 = vpop.xlane.xlu0 %199 }
  0xd1   :  { %v230_v18 = vsub.f32 0.0, %v229_v16  ;;  %v1788_v20 = vpop.xlane.xlu1 %62  ;;  %vm203_vm8 = vcmp.eq.f32.partialorder %v1783_v17, inf  ;;  %vm205_vm9 = vcmp.eq.f32.partialorder %v1783_v17, 0.0 }
  0xd2   :  { %vm66_vm6 = vcmp.eq.f32.partialorder %v1788_v20, inf  ;;  %vm68_vm7 = vcmp.eq.f32.partialorder %v1788_v20, 0.0 }
  0xd3   :  { %v231_v21 = vmul.f32 1.442695, %v230_v18 }
  0xd4   :  { %v700_v24 = vpop.permute.xlu0 %699 }
  0xd5   :  { %1471 = vpow2.f32 %v231_v21  ;;  %v705_v25 = vadd.f32 %v700_v24, %v692_v19  ;;  %v702_v26 = vpop.permute.xlu1 %701  ;;  %v884_v19 = vstv %s1813_s25 }
  0xd6   :  { %v706_v28 = vadd.f32 %v702_v26, %v693_v22 }
  0xd7   :  { %v708_v27 = vadd.f32 %v707_v23, %v705_v25 }
  0xd8   :  { %v662_v29 = vpop.permute.xlu0 %661  ;;  %v709_v31 = vadd.f32 %v707_v23, %v706_v28  ;;  %v227_v23 = vmax.f32 %v1780_v14, 0.0 }
  0xd9   :  { %1473 = vrcp.f32 %v708_v27  ;;  %v664_v33 = vpop.permute.xlu1 %663  ;;  %v667_v51 = vadd.f32 %v662_v29, %v654_v36 }
  0xda   :  { %1475 = vrcp.f32 %v709_v31  ;;  %v668_v1 = vadd.f32 %v664_v33, %v655_v45  ;;  %v228_v36 = vsub.f32 %v227_v23, %v1780_v14 }
  0xdb   :  { %v670_v0 = vadd.f32 %v669_v61, %v667_v51 }
  0xdc   :  { %v681_v37 = vpop.permute.xlu0 %680  ;;  %v671_v15 = vadd.f32 %v669_v61, %v668_v1  ;;  %v206_v1 = vand.u32 2147483648, %v1783_v17 }
  0xdd   :  { %v686_v40 = vadd.f32 %v681_v37, %v673_v32  ;;  %v683_v43 = vpop.permute.xlu1 %682 }
  0xde   :  { %v687_v41 = vadd.f32 %v683_v43, %v674_v39 }
  0xdf   :  { %v1472_v44 = vpop.eup %1471  ;;  %v689_v53 = vadd.f32 %v688_v46, %v686_v40 }
  0xe0   :  { %v896_v54 = vpop.permute.xlu0 %895  ;;  %v233_v55 = vadd.f32 1.0, %v1472_v44  ;;  %v690_v7 = vadd.f32 %v688_v46, %v687_v41  ;;  %v236_v9 = vmul.f32 -0.5, %v1472_v44  ;;  %v239_v26 = vand.u32 2147483647, %v1472_v44 }
  0xe1   :  { %v901_v56 = vadd.f32 %v896_v54, %v888_v42  ;;  %v898_v57 = vpop.permute.xlu1 %897 }
  0xe2   :  { %1477 = vlog2.f32 %v233_v55  ;;  %v902_v62 = vadd.f32 %v898_v57, %v889_v49  ;;  %v237_v22 = vadd.f32 1.0, %v236_v9  ;;  %vm240_vm4 = vcmp.lt.f32.partialorder %v239_v26, 0.0004427343 }
  0xe3   :  { %v1474_v60 = vpop.eup %1473  ;;  %v904_v38 = vadd.f32 %v903_v47, %v901_v56  ;;  %v545_v9 = vlaneseq }
  0xe4   :  { %v714_v2 = vmul.f32 %v1474_v60, %v689_v53  ;;  %v858_v3 = vpop.permute.xlu0 %857  ;;  %v1476_v4 = vpop.eup %1475  ;;  %v905_v5 = vadd.f32 %v903_v47, %v902_v62  ;;  %v712_v16 = vmul.f32 %v1474_v60, %v670_v0  ;;  %v238_v32 = vmul.f32 %v1472_v44, %v237_v22 }
  0xe5   :  { %1479 = vrcp.f32 %v904_v38  ;;  %v715_v11 = vmul.f32 %v1476_v4, %v690_v7  ;;  %v1824_v13 = vpop.permute.xlu1 %859  ;;  %v863_v24 = vadd.f32 %v858_v3, %v850_v10  ;;  %v713_v52 = vmul.f32 %v1476_v4, %v671_v15 }
  0xe6   :  { %718 = vperm.xlu0 %1458, %v714_v2   ;;  %1481 = vrcp.f32 %v905_v5  ;;  %v1048_v47 = vstv %s1829_s27  ;;  %v1067_v53 = vstv %s1837_s28  ;;  %v69_v38 = vand.u32 2147483648, %v1788_v20 }
  0xe7   :  { %723 = vperm.xlu1 %1457, %v715_v11   ;;  %v866_v33 = vadd.f32 %v865_v30, %v863_v24  ;;  %1483 = vrsqrt.f32 %v1788_v20  ;;  %v1049_v49 = vmul.f32 %v1774_v58, %v1048_v47  ;;  %v1068_v54 = vmul.f32 %v1774_v58, %v1067_v53 }
  0xe8   :  { %v877_v18 = vpop.permute.xlu0 %876  ;;  %1485 = vrsqrt.f32 %v1783_v17  ;;  %v546_v10 = vshrl.u32 %v545_v9, 7  ;;  %v1083_v9 = vstv %s1926_s8 }
  0xe9   :  { %v882_v21 = vadd.f32 %v877_v18, %v869_v6  ;;  %v879_v25 = vpop.permute.xlu1 %878  ;;  %v851_v18 = vmul.f32 %v1717_v48, %v849_v63 }
  0xea   :  { %734 = vperm.xlu0 %1458, %v712_v16   ;;  %v883_v27 = vadd.f32 %v879_v25, %v870_v12  ;;  %v1877_v15 = vsub.s32 0, %v546_v10  ;;  %v462_v16 = vld [vmem:[%s2163_s10] sm:$0x3] }
  0xeb   :  { %v885_v29 = vadd.f32 %v884_v19, %v882_v21  ;;  %739 = vperm.xlu1 %1457, %v713_v52   ;;  %v864_v24 = vadd.f32 %v1824_v13, %v851_v18  ;;  %v1299_v18 = vld [vmem:[%s2163_s10 + $0x4] sm:$0x3] }
  0xec   :  { %v1478_v28 = vpop.eup %1477  ;;  %v886_v34 = vadd.f32 %v884_v19, %v883_v27  ;;  %v1834_v35 = vpop.f32.mrb[0].mxu0  ;;  %v1887_v19 = vsub.s32 1, %v546_v10  ;;  %v548_v22 = vrot.slane %v462_v16, %v1877_v15  ;;  %v1084_v10 = vmul.f32 %v1774_v58, %v1083_v9 }
  0xed   :  { %v235_v31 = vmul.f32 0.6931472, %v1478_v28  ;;  %v1356_v39 = vpop.f32.mrb[1].mxu0 }
  0xee   :  { %v564_v52 = vrot.slane %v462_v16, %v1887_v19 }
  0xef   :  { %v1480_v37 = vpop.eup %1479  ;;  %v241_v40 = vsel %vm240_vm4, %v238_v32, %v235_v31  ;;  %v867_v31 = vadd.f32 %v865_v30, %v864_v24  ;;  %v1050_v30 = vmul.f32 %v1766_v50, %v1048_v47  ;;  %v1099_v24 = vstv %s1928_s6 }
  0xf0   :  { %v910_v42 = vmul.f32 %v1480_v37, %v885_v29  ;;  %v242_v43 = vadd.f32 %v241_v40, %v228_v36  ;;  %v1839_v45 = vpop.eup %1481  ;;  %v908_v46 = vmul.f32 %v1480_v37, %v866_v33  ;;  %v1863_v61 = vpop.f32.mrb[0].mxu1 }
  0xf1   :  { %v911_v44 = vmul.f32 %v1839_v45, %v886_v34  ;;  %v1484_v55 = vpop.eup %1483  ;;  %v909_v34 = vmul.f32 %v1839_v45, %v867_v31 }
  0xf2   :  { %914 = vperm.xlu1 %1457, %v910_v42   ;;  %v1843_v14 = vsel %vm73_vm5, %v242_v43, 0.0  ;;  %v65_v56 = vmul.f32 %v1484_v55, %v1788_v20  ;;  %v1486_v57 = vpop.eup %1485 }
  0xf3   :  { %919 = vperm.xlu0 %1458, %v911_v44   ;;  %v202_v60 = vmul.f32 %v1486_v57, %v1783_v17 }
  0xf4   :  { %v1850_v51 = vpop.f32.mrb[2].mxu0  ;;  %v67_v59 = vsel %vm66_vm6, %v1788_v20, %v65_v56  ;;  %v1069_v56 = vmul.f32 %v1766_v50, %v1067_v53 }
  0xf5   :  { %v421_v41 = vpop.f32.mrb[3].mxu0  ;;  %v70_v62 = vsel %vm68_vm7, %v69_v38, %v67_v59  ;;  %v204_v0 = vsel %vm203_vm8, %v1783_v17, %v202_v60  ;;  %v576_v36 = vsub.f32 1.0, %v1850_v51  ;;  %v1278_v13 = vadd.f32 -0.2, %v1850_v51 }
  0xf6   :  { %930 = vperm.xlu1 %1457, %v908_v46   ;;  %v1258_v7 = vadd.f32 -1.0, %v70_v62  ;;  %v207_v2 = vsel %vm205_vm9, %v206_v1, %v204_v0  ;;  %v575_v28 = vsub.f32 1.0, %v421_v41  ;;  %v1277_v29 = vadd.f32 -0.2, %v421_v41 }
  0xf7   :  { %v1260_v4 = vadd.f32 -1.0, %v207_v2  ;;  %v584_v45 = vmax.f32 %v1278_v13, 0.0 }
  0xf8   :  { %v72_v3 = vmul.f32 %v1258_v7, %v1258_v7  ;;  %v577_v37 = vmax.f32 %v575_v28, 0.0  ;;  %v583_v39 = vmax.f32 %v1277_v29, 0.0 }
  0xf9   :  { %v209_v6 = vmul.f32 %v1260_v4, %v1260_v4  ;;  %v1919_v4 = vpop.f32.mrb[1].mxu1 }
  0xfa   :  { %1053 = vrot.lane.b32.xlu1 %v1049_v49, %s1541_s30  ;;  %v74_v5 = vsel %vm73_vm5, %v72_v3, 0.0  ;;  %v578_v49 = vmax.f32 %v576_v36, 0.0 }
  0xfb   :  { %v210_v20 = vsel %vm73_vm5, %v209_v6, 0.0 }
  0xfe   :  { %1072 = vrot.lane.b32.xlu1 %v1068_v54, %s1541_s30 }
 0x112   :  { %75 = vadd.xlane.f32.xlu0 %v74_v5  ;;  %v1921_v5 = vpop.f32.mrb[2].mxu1 }
 0x113   :  { %v1923_v6 = vpop.f32.mrb[3].mxu1 }
 0x116   :  { %211 = vadd.xlane.f32.xlu0 %v210_v20 }
 0x119   :  { %v1875_v12 = vpop.xlane.xlu0 %305 }
 0x11a   :  { %v1873_v11 = vpop.xlane.xlu1 %275 }
 0x11d   :  { %v1092_v21 = vpop.permute.xlu0 %1091 }
 0x11e   :  { %v1879_v17 = vpop.permute.xlu1 %1093 }
 0x122   :  { %v538_v23 = vpop.permute.xlu1 %537 }
 0x123   :  { %v549_v25 = vsub.f32 %v538_v23, %v548_v22  ;;  %v326_v23 = vld [vmem:[%s2164_s11 + $0x38] sm:$0xff] }
 0x125   :  { %v543_v26 = vpop.permute.xlu0 %542  ;;  %v567_v48 = vmul.f32 %v549_v25, %v549_v25 }
 0x126   :  { %v554_v27 = vpop.permute.xlu1 %553  ;;  %v550_v63 = vsub.f32 %v543_v26, %v548_v22  ;;  %v1097_v22 = vadd.f32 %v1092_v21, %v1084_v10  ;;  %v1953_v26 = vrot.slane %v1299_v18, %v1887_v19 }
 0x127   :  { %v565_v32 = vsub.f32 %v554_v27, %v564_v52 }
 0x128   :  { %v568_v44 = vmul.f32 %v550_v63, %v550_v63  ;;  %v1100_v27 = vadd.f32 %v1099_v24, %v1097_v22 }
 0x129   :  { %v569_v33 = vmul.f32 %v565_v32, %v565_v32  ;;  %v1045_v32 = vstv %s1935_s2 }
 0x12a   :  { %v559_v40 = vpop.permute.xlu1 %558  ;;  %1487 = vrcp.f32 %v1100_v27  ;;  %v1046_v36 = vmul.f32 %v1774_v58, %v1045_v32 }
 0x12b   :  { %v571_v42 = vadd.f32 %v569_v33, %v567_v48  ;;  %v566_v43 = vsub.f32 %v559_v40, %v564_v52  ;;  %v1947_v52 = vrot.slane %v1299_v18, %v1877_v15  ;;  %v1064_v48 = vstv %s1937_s0 }
 0x12c   :  { %935 = vperm.xlu0 %1458, %v909_v34   ;;  %v1065_v13 = vmul.f32 %v1774_v58, %v1064_v48 }
 0x12d   :  { %vm573_vm10 = vcmp.le.f32.partialorder %v571_v42, 64.0  ;;  %v570_v46 = vmul.f32 %v566_v43, %v566_v43 }
 0x12e   :  { %v579_v41 = vsel %vm573_vm10, %v577_v37, 0.0  ;;  %v585_v54 = vsel %vm573_vm10, 0.0, %v583_v39  ;;  %v1279_v51 = vsel %vm573_vm10, 1.0, %v1540_v8  ;;  %v1080_v37 = vstv %s1955_s19 }
 0x12f   :  { %v572_v55 = vadd.f32 %v570_v46, %v568_v44  ;;  %v622_v57 = vsel %vm591_vm11, %v585_v54, 0.0  ;;  %v592_v60 = vsel %vm591_vm11, %v1279_v51, 0.0  ;;  %v605_v1 = vsel %vm591_vm11, %v579_v41, 0.0 }
 0x130   :  { %1055 = vrot.lane.b32.xlu0 %v1050_v30, %s1541_s30 }
 0x131   :  { %vm574_vm12 = vcmp.le.f32.partialorder %v572_v55, 64.0  ;;  %v1283_v55 = vld [vmem:[%s2163_s10 + $0x2] sm:$0x3] }
 0x132   :  { %v586_v47 = vsel %vm574_vm12, 0.0, %v584_v45  ;;  %v1280_v59 = vsel %vm574_vm12, 1.0, %v1540_v8  ;;  %v580_v38 = vsel %vm574_vm12, %v578_v49, 0.0  ;;  %v757_v45 = vsub.f32 1.0, %v1863_v61 }
 0x133   :  { %v623_v62 = vsel %vm591_vm11, %v586_v47, 0.0  ;;  %v593_v0 = vsel %vm591_vm11, %v1280_v59, 0.0  ;;  %v606_v7 = vsel %vm591_vm11, %v580_v38, 0.0  ;;  %v745_v51 = vrot.slane %v1283_v55, %v1887_v19 }
 0x134   :  { %1074 = vrot.lane.b32.xlu0 %v1069_v56, %s1541_s30  ;;  %v1913_v53 = vadd.f32 %v623_v62, %v622_v57  ;;  %v1915_v2 = vadd.f32 %v593_v0, %v592_v60  ;;  %v1917_v3 = vadd.f32 %v606_v7, %v605_v1  ;;  %v1488_v44 = vpop.eup %1487  ;;  %v759_v54 = vmax.f32 %v757_v45, 0.0 }
 0x135   :  { %v729_v57 = vrot.slane %v1283_v55, %v1877_v15  ;;  %v1085_v7 = vmul.f32 %v1766_v50, %v1083_v9 }
 0x153   :  { %244 = vadd.xlane.f32.xlu0 %v1843_v14  ;;  %v325_v14 = vld [vmem:[%s2164_s11 + $0x30] sm:$0xff]  ;;  %s1958_s11 = sld [smem:[#allocation2 + $0x1d]] }
 0x154   :  { %1374 = vmatprep.mubr.msk.f32.mxu1 %vm89_vm1, %v325_v14 }
 0x155   :  { %1375 = vmatmul.mubr.msk.f32.gmra.mrb[4].mxu1 %vm89_vm1, %v326_v23 }
 0x159   :  { %v1061_v43 = vstv %s1958_s11 }
 0x165   :  { %v719_v58 = vpop.permute.xlu0 %718 }
 0x166   :  { %v724_v20 = vpop.permute.xlu1 %723  ;;  %v730_v60 = vsub.f32 %v719_v58, %v729_v57  ;;  %v1294_v58 = vadd.f32 -0.2, %v1863_v61 }
 0x167   :  { %v731_v38 = vsub.f32 %v724_v20, %v729_v57 }
 0x168   :  { %v748_v10 = vmul.f32 %v730_v60, %v730_v60 }
 0x169   :  { %v735_v56 = vpop.permute.xlu0 %734  ;;  %v749_v18 = vmul.f32 %v731_v38, %v731_v38 }
 0x16a   :  { %v740_v16 = vpop.permute.xlu1 %739  ;;  %v746_v47 = vsub.f32 %v735_v56, %v745_v51  ;;  %v773_v56 = vmax.f32 %v1294_v58, 0.0 }
 0x16b   :  { %v747_v59 = vsub.f32 %v740_v16, %v745_v51 }
 0x16c   :  { %v750_v62 = vmul.f32 %v746_v47, %v746_v47  ;;  %v952_v47 = vsub.f32 1.0, %v1923_v6 }
 0x16d   :  { %v751_v0 = vmul.f32 %v747_v59, %v747_v59 }
 0x16e   :  { %v1980_v22 = vadd.f32 %v750_v62, %v748_v10  ;;  %v164_v10 = vld [vmem:[%s2157_s4] sm:$0xf] }
 0x16f   :  { %v1982_v14 = vadd.f32 %v751_v0, %v749_v18 }
 0x170   :  { %vm754_vm13 = vcmp.le.f32.partialorder %v1980_v22, 64.0 }
 0x171   :  { %v915_v21 = vpop.permute.xlu1 %914  ;;  %vm755_vm14 = vcmp.le.f32.partialorder %v1982_v14, 64.0  ;;  %v1295_v9 = vsel %vm754_vm13, 1.0, %v1540_v8 }
 0x172   :  { %v926_v25 = vsub.f32 %v915_v21, %v1947_v52  ;;  %v920_v1 = vpop.permute.xlu0 %919 }
 0x173   :  { %v927_v38 = vsub.f32 %v920_v1, %v1947_v52 }
 0x174   :  { %v944_v29 = vmul.f32 %v926_v25, %v926_v25  ;;  %v1098_v25 = vadd.f32 %v1879_v17, %v1085_v7 }
 0x175   :  { %v931_v28 = vpop.permute.xlu1 %930  ;;  %v945_v0 = vmul.f32 %v927_v38, %v927_v38  ;;  %v277_v38 = vrot.slane %v1873_v11, 4 }
 0x176   :  { %v942_v31 = vsub.f32 %v931_v28, %v1953_v26  ;;  %v1101_v16 = vadd.f32 %v1099_v24, %v1098_v25 }
 0x178   :  { %v946_v63 = vmul.f32 %v942_v31, %v942_v31  ;;  %1489 = vrcp.f32 %v1101_v16 }
 0x179   :  { %v1054_v33 = vpop.permute.xlu1 %1053 }
 0x17a   :  { %v1962_v34 = vadd.f32 %v946_v63, %v944_v29  ;;  %v1059_v40 = vadd.f32 %v1054_v33, %v1046_v36  ;;  %v1296_v29 = vsel %vm755_vm14, 1.0, %v1540_v8  ;;  %v788_v63 = vsel %vm591_vm11, %v1295_v9, 0.0 }
 0x17b   :  { %v789_v33 = vsel %vm591_vm11, %v1296_v29, 0.0 }
 0x17c   :  { %v1062_v46 = vadd.f32 %v1061_v43, %v1059_v40  ;;  %vm950_vm0 = vcmp.le.f32.partialorder %v1962_v34, 64.0 }
 0x17d   :  { %v1073_v39 = vpop.permute.xlu1 %1072  ;;  %v1311_v25 = vsel %vm950_vm0, 1.0, %v1540_v8 }
 0x17e   :  { %v1078_v42 = vadd.f32 %v1073_v39, %v1065_v13  ;;  %v1104_v41 = vmul.f32 %v1488_v44, %v1062_v46  ;;  %v1047_v13 = vmul.f32 %v1766_v50, %v1045_v32  ;;  %v790_v39 = vadd.f32 %v789_v33, %v788_v63 }
 0x180   :  { %v1081_v30 = vadd.f32 %v1080_v37, %v1078_v42  ;;  %v163_v42 = vmul.f32 2.0, %v1834_v35  ;;  %v756_v35 = vsub.f32 1.0, %v1919_v4 }
 0x182   :  { %v1106_v49 = vmul.f32 %v1488_v44, %v1081_v30  ;;  %v1066_v44 = vmul.f32 %v1766_v50, %v1064_v48  ;;  %v758_v50 = vmax.f32 %v756_v35, 0.0  ;;  %v1293_v48 = vadd.f32 -0.2, %v1919_v4 }
 0x183   :  { %v165_v1 = vmax.f32 %v163_v42, 0.0 }
 0x184   :  { %1110 = vperm.xlu0 %1458, %v1106_v49   ;;  %v1490_v49 = vpop.eup %1489  ;;  %v772_v61 = vmax.f32 %v1293_v48, 0.0 }
 0x188   :  { %1126 = vperm.xlu0 %1458, %v1104_v41   ;;  %v168_v41 = vand.u32 2147483647, %v163_v42 }
 0x18a   :  { %v169_v32 = vsub.f32 0.0, %v168_v41 }
 0x18c   :  { %764 = vrot.lane.b32.xlu0 %v759_v54, %s1543_s9  ;;  %v170_v57 = vmul.f32 1.442695, %v169_v32 }
 0x18e   :  { %1491 = vpow2.f32 %v170_v57 }
 0x19f   :  { %v76_v23 = vpop.xlane.xlu0 %75 }
 0x1a0   :  { %v77_v21 = vrot.slane %v76_v23, 4 }
 0x1a2   :  { %v78_v27 = vadd.f32 %v77_v21, %v76_v23  ;;  %v166_v21 = vmul.f32 %v164_v10, %v163_v42 }
 0x1a3   :  { %v1993_v31 = vpop.xlane.xlu0 %211 }
 0x1a4   :  { %v79_v20 = vrot.slane %v78_v27, 2  ;;  %v167_v29 = vsub.f32 %v165_v1, %v166_v21  ;;  %v213_v22 = vrot.slane %v1993_v31, 4 }
 0x1a6   :  { %v80_v28 = vadd.f32 %v79_v20, %v78_v27 }
 0x1a8   :  { %v81_v17 = vrot.slane %v80_v28, 1 }
 0x1aa   :  { %v82_v24 = vadd.f32 %v81_v17, %v80_v28  ;;  %v984_v28 = vsel %vm591_vm11, %v1311_v25, 0.0 }
 0x1ab   :  { %625 = vadd.xlane.f32.xlu0 %v1913_v53  ;;  %v936_v36 = vpop.permute.xlu0 %935 }
 0x1ac   :  { %1395 = vpush %v82_v24  ;;  %v943_v59 = vsub.f32 %v936_v36, %v1953_v26  ;;  %v1315_v36 = vld [vmem:[%s2163_s10 + $0x6] sm:$0x3] }
 0x1ae   :  { %v947_v62 = vmul.f32 %v943_v59, %v943_v59  ;;  %v1309_v59 = vadd.f32 -0.2, %v1923_v6 }
 0x1af   :  { %791 = vadd.xlane.f32.xlu0 %v790_v39  ;;  %v1056_v40 = vpop.permute.xlu0 %1055 }
 0x1b0   :  { %v1060_v30 = vadd.f32 %v1056_v40, %v1047_v13  ;;  %v2015_v7 = vadd.f32 %v947_v62, %v945_v0  ;;  %v2035_v13 = vrot.slane %v1315_v36, %v1877_v15  ;;  %v2038_v40 = vrot.slane %v1315_v36, %v1887_v19 }
 0x1b1   :  { %v307_v62 = vrot.slane %v1875_v12, 4  ;;  %v214_v0 = vadd.f32 %v213_v22, %v1993_v31 }
 0x1b2   :  { %v1063_v46 = vadd.f32 %v1061_v43, %v1060_v30  ;;  %v954_v43 = vmax.f32 %v952_v47, 0.0  ;;  %vm951_vm15 = vcmp.le.f32.partialorder %v2015_v7, 64.0 }
 0x1b3   :  { %v1075_v45 = vpop.permute.xlu0 %1074  ;;  %v1312_v52 = vsel %vm951_vm15, 1.0, %v1540_v8  ;;  %v308_v10 = vadd.f32 %v307_v62, %v1875_v12 }
 0x1b4   :  { %v1079_v53 = vadd.f32 %v1075_v45, %v1066_v44  ;;  %v1105_v54 = vmul.f32 %v1490_v49, %v1063_v46  ;;  %v985_v27 = vsel %vm591_vm11, %v1312_v52, 0.0  ;;  %v953_v45 = vsub.f32 1.0, %v1921_v5 }
 0x1b5   :  { %v986_v9 = vadd.f32 %v985_v27, %v984_v28  ;;  %v309_v1 = vrot.slane %v308_v10, 2 }
 0x1b6   :  { %v1082_v55 = vadd.f32 %v1080_v37, %v1079_v53  ;;  %v1492_v37 = vpop.eup %1491  ;;  %v955_v41 = vmax.f32 %v953_v45, 0.0 }
 0x1b7   :  { %v172_v60 = vadd.f32 1.0, %v1492_v37  ;;  %v175_v4 = vmul.f32 -0.5, %v1492_v37  ;;  %v178_v26 = vand.u32 2147483647, %v1492_v37 }
 0x1b8   :  { %v1107_v51 = vmul.f32 %v1490_v49, %v1082_v55 }
 0x1b9   :  { %1493 = vlog2.f32 %v172_v60  ;;  %v176_v18 = vadd.f32 1.0, %v175_v4  ;;  %vm179_vm1 = vcmp.lt.f32.partialorder %v178_v26, 0.0004427343  ;;  %v968_v60 = vmax.f32 %v1309_v59, 0.0 }
 0x1ba   :  { %1115 = vperm.xlu1 %1457, %v1107_v51   ;;  %v278_v4 = vadd.f32 %v277_v38, %v1873_v11 }
 0x1bb   :  { %v177_v16 = vmul.f32 %v1492_v37, %v176_v18  ;;  %v215_v18 = vrot.slane %v214_v0, 2 }
 0x1bc   :  { %v279_v26 = vrot.slane %v278_v4, 2 }
 0x1bd   :  { %v216_v27 = vadd.f32 %v215_v18, %v214_v0 }
 0x1be   :  { %778 = vrot.lane.b32.xlu1 %v773_v56, %s1543_s9 }
 0x1c2   :  { %762 = vrot.lane.b32.xlu1 %v758_v50, %s1543_s9 }
 0x1c3   :  { %v1494_v23 = vpop.eup %1493 }
 0x1c4   :  { %v174_v20 = vmul.f32 0.6931472, %v1494_v23 }
 0x1c5   :  { %958 = vrot.lane.b32.xlu0 %v954_v43, %s1544_s15  ;;  %v1310_v43 = vadd.f32 -0.2, %v1921_v5 }
 0x1c6   :  { %776 = vrot.lane.b32.xlu1 %v772_v61, %s1543_s9  ;;  %v180_v17 = vsel %vm179_vm1, %v177_v16, %v174_v20 }
 0x1c7   :  { %v181_v63 = vadd.f32 %v180_v17, %v167_v29  ;;  %v969_v37 = vmax.f32 %v1310_v43, 0.0  ;;  %v310_v17 = vadd.f32 %v309_v1, %v308_v10 }
 0x1c9   :  { %v183_v33 = vsel %vm182_vm2, %v181_v63, 0.0  ;;  %v217_v63 = vrot.slane %v216_v27, 1 }
 0x1dd   :  { %s1396_s10 = spop %1395 }
 0x1de   :  { %s84_s5 = smul.f32 0.25, %s1396_s10 }
 0x1e0   :  { %v245_v24 = vpop.xlane.xlu0 %244 }
 0x1e1   :  { %v246_v14 = vrot.slane %v245_v24, 4 }
 0x1e3   :  { %v247_v5 = vadd.f32 %v246_v14, %v245_v24 }
 0x1e4   :  { %987 = vadd.xlane.f32.xlu0 %v986_v9  ;;  %v280_v9 = vadd.f32 %v279_v26, %v278_v4 }
 0x1e5   :  { %v248_v6 = vrot.slane %v247_v5, 2 }
 0x1e6   :  { %v281_v24 = vrot.slane %v280_v9, 1 }
 0x1e7   :  { %v249_v28 = vadd.f32 %v248_v6, %v247_v5 }
 0x1e8   :  { %v282_v45 = vadd.f32 %v281_v24, %v280_v9 }
 0x1e9   :  { %v250_v12 = vrot.slane %v249_v28, 1 }
 0x1ea   :  { %184 = vadd.xlane.f32.xlu1 %v183_v33 }
 0x1ee   :  { %595 = vadd.xlane.f32.xlu1 %v1915_v2 }
 0x1ff   :  { %1131 = vperm.xlu1 %1457, %v1105_v54  }
 0x203   :  { %v1111_v39 = vpop.permute.xlu0 %1110 }
 0x204   :  { %v1122_v42 = vsub.f32 %v1111_v39, %v2035_v13  ;;  %v311_v39 = vrot.slane %v310_v17, 1 }
 0x206   :  { %v1140_v46 = vmul.f32 %v1122_v42, %v1122_v42 }
 0x207   :  { %v1127_v30 = vpop.permute.xlu0 %1126 }
 0x208   :  { %v1138_v44 = vsub.f32 %v1127_v30, %v2038_v40  ;;  %v218_v30 = vadd.f32 %v217_v63, %v216_v27 }
 0x20a   :  { %v1142_v2 = vmul.f32 %v1138_v44, %v1138_v44  ;;  %v251_v44 = vadd.f32 %v250_v12, %v249_v28 }
 0x20b   :  { %v765_v19 = vpop.permute.xlu0 %764 }
 0x20c   :  { %v2042_v49 = vadd.f32 %v1142_v2, %v1140_v46  ;;  %v769_v54 = vsel %vm755_vm14, %v765_v19, 0.0 }
 0x20d   :  { %v802_v32 = vsel %vm591_vm11, %v769_v54, 0.0 }
 0x20e   :  { %vm1146_vm4 = vcmp.le.f32.partialorder %v2042_v49, 64.0 }
 0x223   :  { %608 = vadd.xlane.f32.xlu1 %v1917_v3 }
 0x228   :  { %v2055_v56 = vpop.f32.mrb[4].mxu1 }
 0x229   :  { %v2073_v2 = vpop.f32.mrb[5].mxu1 }
 0x234   :  { %960 = vrot.lane.b32.xlu1 %v955_v41, %s1544_s15  ;;  %v312_v41 = vadd.f32 %v311_v39, %v310_v17 }
 0x239   :  { %v2047_v15 = vpop.permute.xlu1 %1115 }
 0x23a   :  { %v1123_v63 = vsub.f32 %v2047_v15, %v2035_v13  ;;  %v1327_v15 = vsel %vm1146_vm4, 1.0, %v1540_v8 }
 0x23c   :  { %v1141_v24 = vmul.f32 %v1123_v63, %v1123_v63 }
 0x23d   :  { %v779_v53 = vpop.permute.xlu1 %778 }
 0x23e   :  { %v783_v47 = vsel %vm755_vm14, 0.0, %v779_v53  ;;  %v626_v53 = vpop.xlane.xlu0 %625 }
 0x23f   :  { %v819_v48 = vsel %vm591_vm11, %v783_v47, 0.0  ;;  %v627_v47 = vrot.slane %v626_v53, 4 }
 0x241   :  { %v763_v58 = vpop.permute.xlu1 %762 }
 0x242   :  { %v768_v55 = vsel %vm754_vm13, %v763_v58, 0.0  ;;  %v792_v54 = vpop.xlane.xlu0 %791 }
 0x243   :  { %v801_v3 = vsel %vm591_vm11, %v768_v55, 0.0  ;;  %v793_v22 = vrot.slane %v792_v54, 4 }
 0x244   :  { %v803_v51 = vadd.f32 %v802_v32, %v801_v3 }
 0x245   :  { %v777_v57 = vpop.permute.xlu1 %776  ;;  %v794_v0 = vadd.f32 %v793_v22, %v792_v54 }
 0x246   :  { %804 = vadd.xlane.f32.xlu0 %v803_v51  ;;  %v782_v35 = vsel %vm754_vm13, 0.0, %v777_v57  ;;  %v959_v55 = vpop.permute.xlu0 %958 }
 0x247   :  { %v818_v50 = vsel %vm591_vm11, %v782_v35, 0.0  ;;  %v964_v51 = vsel %vm950_vm0, %v959_v55, 0.0  ;;  %v795_v4 = vrot.slane %v794_v0, 2 }
 0x248   :  { %v820_v61 = vadd.f32 %v819_v48, %v818_v50  ;;  %v997_v43 = vsel %vm591_vm11, %v964_v51, 0.0 }
 0x258   :  { %821 = vadd.xlane.f32.xlu1 %v820_v61 }
 0x25c   :  { %974 = vrot.lane.b32.xlu0 %v969_v37, %s1544_s15 }
 0x269   :  { %972 = vrot.lane.b32.xlu1 %v968_v60, %s1544_s15  ;;  %v628_v60 = vadd.f32 %v627_v47, %v626_v53  ;;  %v1180_v53 = vsel %vm591_vm11, %v1327_v15, 0.0 }
 0x26b   :  { %v629_v62 = vrot.slane %v628_v60, 2 }
 0x26d   :  { %v630_v10 = vadd.f32 %v629_v62, %v628_v60 }
 0x26f   :  { %v631_v6 = vrot.slane %v630_v10, 1 }
 0x277   :  { %v185_v23 = vpop.xlane.xlu1 %184 }
 0x278   :  { %v186_v52 = vrot.slane %v185_v23, 4 }
 0x27a   :  { %v187_v21 = vadd.f32 %v186_v52, %v185_v23  ;;  %v1149_v23 = vsub.f32 1.0, %v2055_v56  ;;  %v796_v52 = vadd.f32 %v795_v4, %v794_v0 }
 0x27b   :  { %v596_v25 = vpop.xlane.xlu1 %595 }
 0x27c   :  { %v188_v20 = vrot.slane %v187_v21, 2  ;;  %v597_v16 = vrot.slane %v596_v25, 4  ;;  %v1151_v26 = vmax.f32 %v1149_v23, 0.0 }
 0x27e   :  { %v598_v29 = vadd.f32 %v597_v16, %v596_v25  ;;  %v189_v31 = vadd.f32 %v188_v20, %v187_v21  ;;  %v632_v21 = vadd.f32 %v631_v6, %v630_v10  ;;  %v797_v25 = vrot.slane %v796_v52, 1  ;;  %v988_v16 = vpop.xlane.xlu0 %987 }
 0x27f   :  { %v2075_v58 = vpop.permute.xlu1 %1131  ;;  %v989_v55 = vrot.slane %v988_v16, 4 }
 0x280   :  { %v599_v11 = vrot.slane %v598_v29, 2  ;;  %v190_v33 = vrot.slane %v189_v31, 1  ;;  %v798_v20 = vadd.f32 %v797_v25, %v796_v52 }
 0x281   :  { %v990_v34 = vadd.f32 %v989_v55, %v988_v16 }
 0x282   :  { %v191_v36 = vadd.f32 %v190_v33, %v189_v31  ;;  %v600_v42 = vadd.f32 %v599_v11, %v598_v29  ;;  %v1139_v31 = vsub.f32 %v2075_v58, %v2038_v40 }
 0x283   :  { %v991_v47 = vrot.slane %v990_v34, 2 }
 0x284   :  { %1397 = vpush %v191_v36  ;;  %v601_v46 = vrot.slane %v600_v42, 1  ;;  %v1143_v33 = vmul.f32 %v1139_v31, %v1139_v31 }
 0x285   :  { %1399 = vpush %v218_v30 }
 0x286   :  { %1401 = vpush %v251_v44  ;;  %v602_v19 = vadd.f32 %v601_v46, %v600_v42  ;;  %v2096_v39 = vadd.f32 %v1143_v33, %v1141_v24 }
 0x287   :  { %1403 = vpush %v282_v45 }
 0x288   :  { %1405 = vpush %v312_v41  ;;  %vm1147_vm3 = vcmp.le.f32.partialorder %v2096_v39, 64.0 }
 0x289   :  { %1407 = vpush %v602_v19  ;;  %v1328_v40 = vsel %vm1147_vm3, 1.0, %v1540_v8 }
 0x28a   :  { %v1181_v46 = vsel %vm591_vm11, %v1328_v40, 0.0 }
 0x28b   :  { %v1182_v54 = vadd.f32 %v1181_v46, %v1180_v53 }
 0x2b0   :  { %v609_v32 = vpop.xlane.xlu1 %608 }
 0x2b1   :  { %v610_v3 = vrot.slane %v609_v32, 4 }
 0x2b3   :  { %v611_v57 = vadd.f32 %v610_v3, %v609_v32  ;;  %v1148_v32 = vsub.f32 1.0, %v2073_v2 }
 0x2b4   :  { %v961_v35 = vpop.permute.xlu1 %960 }
 0x2b5   :  { %v612_v50 = vrot.slane %v611_v57, 2  ;;  %v965_v48 = vsel %vm951_vm15, %v961_v35, 0.0  ;;  %s1398_s7 = spop %1397  ;;  %v1150_v51 = vmax.f32 %v1148_v32, 0.0 }
 0x2b6   :  { %v998_v61 = vsel %vm591_vm11, %v965_v48, 0.0  ;;  %s195_s24 = smul.f32 0.00390625, %s1398_s7  ;;  %s1400_s25 = spop %1399  ;;  %v1326_v48 = vadd.f32 -0.2, %v2055_v56 }
 0x2b7   :  { %s220_s26 = smul.f32 0.25, %s1400_s25  ;;  %s1402_s27 = spop %1401  ;;  %v999_v37 = vadd.f32 %v998_v61, %v997_v43  ;;  %v613_v59 = vadd.f32 %v612_v50, %v611_v57  ;;  %v1325_v57 = vadd.f32 -0.2, %v2073_v2 }
 0x2b8   :  { %s255_s28 = smul.f32 0.25, %s1402_s27  ;;  %s1404_s3 = spop %1403 }
 0x2b9   :  { %s221_s29 = sadd.f32 %s220_s26, %s84_s5  ;;  %s286_s8 = smul.f32 0.0009765625, %s1404_s3  ;;  %1000 = vadd.xlane.f32.xlu1 %v999_v37  ;;  %v614_v14 = vrot.slane %v613_v59, 1  ;;  %v1164_v43 = vmax.f32 %v1325_v57, 0.0  ;;  %v992_v37 = vadd.f32 %v991_v47, %v990_v34 }
 0x2ba   :  { %s256_s6 = sadd.f32 %s255_s28, %s195_s24  ;;  %s1406_s30 = spop %1405 }
 0x2bb   :  { %s1228_s16 = smul.f32 0.1, %s221_s29  ;;  %s287_s2 = ssub.f32 0.0, %s286_s8  ;;  %v615_v38 = vadd.f32 %v614_v14, %v613_v59  ;;  %v1165_v59 = vmax.f32 %v1326_v48, 0.0  ;;  %v993_v22 = vrot.slane %v992_v37, 1 }
 0x2bc   :  { %1237 = sst [smem:[#allocation5 + $0x1]] %s256_s6  ;;  %s316_s0 = smul.f32 0.0009765625, %s1406_s30 }
 0x2bd   :  { %1239 = sst [smem:[#allocation5 + $0x2]] %s1228_s16  ;;  %s1408_s17 = spop %1407  ;;  %1409 = vpush %v615_v38  ;;  %v994_v62 = vadd.f32 %v993_v22, %v992_v37 }
 0x2be   :  { %s2083_s18 = sadd.f32 %s1228_s16, %s256_s6  ;;  %v617_v5 = vstv %s1408_s17 }
 0x2bf   :  { %s317_s12 = ssub.f32 0.0, %s316_s0  ;;  %1495 = vrcp.f32 %v617_v5 }
 0x2c0   :  { %s604_s14 = ssub.f32 256.0, %s1408_s17 }
 0x2c1   :  { %s318_s19 = sadd.f32 %s317_s12, %s287_s2 }
 0x2c2   :  { %v634_v18 = vstv %s604_s14 }
 0x2c3   :  { %s2086_s11 = smul.f32 10.0, %s318_s19  ;;  %1497 = vrcp.f32 %v634_v18 }
 0x2c5   :  { %s1232_s9 = sadd.f32 %s2083_s18, %s2086_s11 }
 0x2c6   :  { %1241 = sst [smem:[#allocation5 + $0x3]] %s2086_s11 }
 0x2c9   :  { %v1496_v1 = vpop.eup %1495 }
 0x2ca   :  { %1411 = vpush %v1496_v1  ;;  %1156 = vrot.lane.b32.xlu1 %v1151_v26, %s1545_s20 }
 0x2cb   :  { %1413 = vpush %v632_v21 }
 0x2cd   :  { %v1498_v27 = vpop.eup %1497 }
 0x2ce   :  { %1415 = vpush %v1498_v27 }
 0x2cf   :  { %1417 = vpush %v798_v20 }
 0x2d3   :  { %v805_v28 = vpop.xlane.xlu0 %804 }
 0x2d4   :  { %v806_v9 = vrot.slane %v805_v28, 4 }
 0x2d6   :  { %v807_v29 = vadd.f32 %v806_v9, %v805_v28 }
 0x2d7   :  { %v975_v42 = vpop.permute.xlu0 %974 }
 0x2d8   :  { %v808_v17 = vrot.slane %v807_v29, 2  ;;  %v979_v13 = vsel %vm951_vm15, 0.0, %v975_v42 }
 0x2d9   :  { %v1015_v41 = vsel %vm591_vm11, %v979_v13, 0.0 }
 0x2da   :  { %v809_v11 = vadd.f32 %v808_v17, %v807_v29 }
 0x2dc   :  { %v810_v12 = vrot.slane %v809_v11, 1 }
 0x2de   :  { %v811_v36 = vadd.f32 %v810_v12, %v809_v11 }
 0x2e0   :  { %1419 = vpush %v811_v36 }
 0x2e5   :  { %v822_v30 = vpop.xlane.xlu1 %821 }
 0x2e6   :  { %v823_v7 = vrot.slane %v822_v30, 4 }
 0x2e8   :  { %v824_v8 = vadd.f32 %v823_v7, %v822_v30 }
 0x2e9   :  { %v973_v44 = vpop.permute.xlu1 %972 }
 0x2ea   :  { %v978_v45 = vsel %vm950_vm0, 0.0, %v973_v44  ;;  %v825_v3 = vrot.slane %v824_v8, 2 }
 0x2eb   :  { %v1014_v19 = vsel %vm591_vm11, %v978_v45, 0.0 }
 0x2ec   :  { %v1016_v58 = vadd.f32 %v1015_v41, %v1014_v19  ;;  %v826_v61 = vadd.f32 %v825_v3, %v824_v8 }
 0x2ee   :  { %1183 = vadd.xlane.f32.xlu1 %v1182_v54  ;;  %1017 = vadd.xlane.f32.xlu0 %v1016_v58  ;;  %s1410_s1 = spop %1409  ;;  %v827_v60 = vrot.slane %v826_v61, 1 }
 0x2f0   :  { %v828_v14 = vadd.f32 %v827_v60, %v826_v61 }
 0x2fb   :  { %s1412_s15 = spop %1411 }
 0x2fc   :  { %s620_s21 = smul.f32 %s1412_s15, %s1410_s1  ;;  %s1414_s22 = spop %1413 }
 0x2ff   :  { %s1416_s4 = spop %1415 }
 0x300   :  { %s637_s23 = smul.f32 %s1416_s4, %s1414_s22  ;;  %s1418_s10 = spop %1417 }
 0x301   :  { %s800_s5 = ssub.f32 256.0, %s1418_s10  ;;  %v813_v35 = vstv %s1418_s10 }
 0x302   :  { %s638_s7 = sadd.f32 %s637_s23, %s620_s21  ;;  %1499 = vrcp.f32 %v813_v35 }
 0x303   :  { %v830_v50 = vstv %s800_s5 }
 0x304   :  { %1501 = vrcp.f32 %v830_v50  ;;  %1154 = vrot.lane.b32.xlu0 %v1150_v51, %s1545_s20 }
 0x308   :  { %1168 = vrot.lane.b32.xlu0 %v1164_v43, %s1545_s20 }
 0x30c   :  { %v1500_v2 = vpop.eup %1499  ;;  %1170 = vrot.lane.b32.xlu0 %v1165_v59, %s1545_s20 }
 0x30d   :  { %1421 = vpush %v1500_v2 }
 0x30e   :  { %v1502_v38 = vpop.eup %1501  ;;  %1423 = vpush %v828_v14 }
 0x30f   :  { %1425 = vpush %v1502_v38 }
 0x310   :  { %1427 = vpush %v994_v62 }
 0x311   :  { %s1420_s24 = spop %1419 }
 0x33e   :  { %s1422_s25 = spop %1421 }
 0x33f   :  { %s816_s26 = smul.f32 %s1422_s25, %s1420_s24  ;;  %s1424_s27 = spop %1423 }
 0x340   :  { %s1426_s28 = spop %1425 }
 0x341   :  { %s817_s3 = sadd.f32 %s816_s26, %s638_s7  ;;  %s833_s29 = smul.f32 %s1426_s28, %s1424_s27 }
 0x342   :  { %s1428_s6 = spop %1427 }
 0x343   :  { %s2120_s8 = sadd.f32 %s833_s29, %s817_s3  ;;  %v1009_v56 = vstv %s1428_s6  ;;  %s1523_s29 = scalar_lea.hbm %s2166_s13, 16 }
 0x344   :  { %1503 = vrcp.f32 %v1009_v56  ;;  %s996_s30 = ssub.f32 256.0, %s1428_s6  ;;  %p1524_p5 = scmp.ne.s32.totalorder %s2166_s13, %s1523_s29 }
 0x345   :  { %p1527_p6 = scmp.lt.u32.totalorder %s1523_s29, %s2166_s13 }
 0x346   :  { %v1001_v0 = vpop.xlane.xlu1 %1000  ;;  %v1026_v1 = vstv %s996_s30 }
 0x347   :  { %v1002_v5 = vrot.slane %v1001_v0, 4  ;;  %1505 = vrcp.f32 %v1026_v1  ;;  %p1529_p7 = pnand %p1527_p6, %p1524_p5 }
 0x349   :  { %v1003_v4 = vadd.f32 %v1002_v5, %v1001_v0 }
 0x34a   :  { %v1157_v26 = vpop.permute.xlu1 %1156 }
 0x34b   :  { %v1004_v10 = vrot.slane %v1003_v4, 2  ;;  %v1161_v16 = vsel %vm1147_vm3, %v1157_v26, 0.0 }
 0x34c   :  { %v1194_v11 = vsel %vm591_vm11, %v1161_v16, 0.0 }
 0x34d   :  { %v1005_v18 = vadd.f32 %v1004_v10, %v1003_v4 }
 0x34e   :  { %v1504_v52 = vpop.eup %1503 }
 0x34f   :  { %v1006_v23 = vrot.slane %v1005_v18, 1 }
 0x351   :  { %v1007_v6 = vadd.f32 %v1006_v23, %v1005_v18  ;;  %v1506_v45 = vpop.eup %1505 }
 0x353   :  { %1429 = vpush %v1007_v6 }
 0x354   :  { %1431 = vpush %v1504_v52 }
 0x37b   :  { %v1018_v21 = vpop.xlane.xlu0 %1017  ;;  %v1184_v25 = vpop.xlane.xlu1 %1183 }
 0x37c   :  { %v1019_v27 = vrot.slane %v1018_v21, 4  ;;  %v1185_v20 = vrot.slane %v1184_v25, 4 }
 0x37e   :  { %v1020_v28 = vadd.f32 %v1019_v27, %v1018_v21  ;;  %v1186_v9 = vadd.f32 %v1185_v20, %v1184_v25 }
 0x37f   :  { %v1155_v29 = vpop.permute.xlu0 %1154 }
 0x380   :  { %v1021_v31 = vrot.slane %v1020_v28, 2  ;;  %v1187_v17 = vrot.slane %v1186_v9, 2  ;;  %v1160_v63 = vsel %vm1146_vm4, %v1155_v29, 0.0 }
 0x381   :  { %v1193_v33 = vsel %vm591_vm11, %v1160_v63, 0.0 }
 0x382   :  { %v1195_v12 = vadd.f32 %v1194_v11, %v1193_v33  ;;  %v1022_v24 = vadd.f32 %v1021_v31, %v1020_v28  ;;  %v1188_v36 = vadd.f32 %v1187_v17, %v1186_v9 }
 0x383   :  { %v1169_v42 = vpop.permute.xlu0 %1168 }
 0x384   :  { %s1430_s16 = spop %1429  ;;  %1196 = vadd.xlane.f32.xlu0 %v1195_v12  ;;  %v1023_v30 = vrot.slane %v1022_v24, 1  ;;  %v1189_v40 = vrot.slane %v1188_v36, 1  ;;  %v1174_v13 = vsel %vm1146_vm4, 0.0, %v1169_v42 }
 0x385   :  { %s1432_s2 = spop %1431  ;;  %v1210_v19 = vsel %vm591_vm11, %v1174_v13, 0.0 }
 0x386   :  { %s1012_s0 = smul.f32 %s1432_s2, %s1430_s16  ;;  %v1024_v15 = vadd.f32 %v1023_v30, %v1022_v24  ;;  %v1190_v44 = vadd.f32 %v1189_v40, %v1188_v36 }
 0x387   :  { %v1171_v46 = vpop.permute.xlu0 %1170 }
 0x388   :  { %s1013_s17 = sadd.f32 %s1012_s0, %s2120_s8  ;;  %v1175_v41 = vsel %vm1147_vm3, 0.0, %v1171_v46  ;;  %1433 = vpush %v1024_v15 }
 0x389   :  { %v1211_v53 = vsel %vm591_vm11, %v1175_v41, 0.0  ;;  %1435 = vpush %v1506_v45 }
 0x38a   :  { %1437 = vpush %v1190_v44  ;;  %v1212_v54 = vadd.f32 %v1211_v53, %v1210_v19 }
 0x38c   :  { %1213 = vadd.xlane.f32.xlu1 %v1212_v54 }
 0x3b9   :  { %s1434_s12 = spop %1433 }
 0x3ba   :  { %s1436_s14 = spop %1435 }
 0x3bb   :  { %s1029_s19 = smul.f32 %s1436_s14, %s1434_s12  ;;  %s1438_s1 = spop %1437 }
 0x3bc   :  { %v1205_v49 = vstv %s1438_s1  ;;  %s1192_s15 = ssub.f32 256.0, %s1438_s1 }
 0x3bd   :  { %s2135_s20 = sadd.f32 %s1029_s19, %s1013_s17  ;;  %1507 = vrcp.f32 %v1205_v49 }
 0x3be   :  { %v1222_v32 = vstv %s1192_s15 }
 0x3bf   :  { %1509 = vrcp.f32 %v1222_v32 }
 0x3c7   :  { %v1508_v47 = vpop.eup %1507 }
 0x3c9   :  { %v1510_v37 = vpop.eup %1509 }
 0x411   :  { %v1197_v58 = vpop.xlane.xlu0 %1196 }
 0x412   :  { %v1198_v7 = vrot.slane %v1197_v58, 4 }
 0x414   :  { %v1199_v39 = vadd.f32 %v1198_v7, %v1197_v58 }
 0x416   :  { %v1200_v55 = vrot.slane %v1199_v39, 2 }
 0x418   :  { %v1201_v8 = vadd.f32 %v1200_v55, %v1199_v39 }
 0x419   :  { %v1214_v34 = vpop.xlane.xlu1 %1213 }
 0x41a   :  { %v1215_v3 = vrot.slane %v1214_v34, 4  ;;  %v1202_v51 = vrot.slane %v1201_v8, 1 }
 0x41c   :  { %v1216_v57 = vadd.f32 %v1215_v3, %v1214_v34  ;;  %v1203_v35 = vadd.f32 %v1202_v51, %v1201_v8 }
 0x41e   :  { %v1217_v50 = vrot.slane %v1216_v57, 2  ;;  %1439 = vpush %v1203_v35 }
 0x41f   :  { %1441 = vpush %v1508_v47 }
 0x420   :  { %v1218_v48 = vadd.f32 %v1217_v50, %v1216_v57 }
 0x422   :  { %v1219_v43 = vrot.slane %v1218_v48, 1 }
 0x424   :  { %v1220_v61 = vadd.f32 %v1219_v43, %v1218_v48 }
 0x426   :  { %1443 = vpush %v1220_v61 }
 0x427   :  { %1445 = vpush %v1510_v37 }
 0x44f   :  { %s1440_s21 = spop %1439 }
 0x450   :  { %s1442_s22 = spop %1441 }
 0x451   :  { %s1208_s4 = smul.f32 %s1442_s22, %s1440_s21 }
 0x453   :  { %s1209_s5 = sadd.f32 %s1208_s4, %s2135_s20 }
 0x457   :  { %s1444_s23 = spop %1443 }
 0x458   :  { %s1446_s10 = spop %1445 }
 0x459   :  { %s1225_s7 = smul.f32 %s1446_s10, %s1444_s23 }
 0x45b   :  { %s1226_s24 = sadd.f32 %s1225_s7, %s1209_s5 }
 0x45d   :  { %s1227_s25 = smul.f32 0.25, %s1226_s24 }
 0x45f   :  { %s1230_s26 = smul.f32 0.001, %s1227_s25 }
 0x461   :  { %s1233_s27 = sadd.f32 %s1232_s9, %s1230_s26 }
 0x462   :  { %1243 = sst [smem:[#allocation5 + $0x4]] %s1230_s26 }
 0x463   :  { %1235 = sst [smem:[#allocation5]] %s1233_s27 }
 0x464   :  { %1532 = shalt.err (!%p1529_p7)
}
 0x465   :  { %s1546_s2 = smov [#allocation5]  }
 0x466   :  { %1251 = dma.smem_to_hbm %s1546_s2, 16, %s2166_s13, [#allocation3]  }
 0x467   :  { %1535 = dma.done.wait [#allocation3], 16  }
 0x468   :  { %1536 = vsyncadd [#allocation3], 4294967280 }
 0x469   :  { %1255 = sfence }
 0x46a   :  { %1256 = vsyncpa [#allocation3], 1 }
 0x46b   :  { %1257 = vsyncpa [#allocation4], 1 }

</bundles_post_ra>
